<compile_context>
chip_gen: v6e
topology: v6e:2x2x1
jax: 0.10.0
libtpu: 0.0.40
codegen_flags: <defaults>
</compile_context>

<pallas_src>
import functools

import jax
import jax.numpy as jnp
from jax.experimental import pallas as pl
from jax.experimental.pallas import tpu as pltpu

_LANE = 512             # lane width of the packed layout (multiple of 128)
_SUBLANE = 8            # sublane granule (second-minor alignment)
_MAX_BLOCK_ROWS = 256   # 256 * 512 = 131072 boxes per grid step


def _kld_kernel(boxes_ref, out_ref, *, taf, loss_weight):
    # boxes_ref: (10, block_rows, LANE) f32,
    #            planes 0..4 = pred [x,y,w,h,a], planes 5..9 = target [x,y,w,h,a]
    # out_ref:   (block_rows, LANE) f32
    px = boxes_ref[0]
    py = boxes_ref[1]
    pw = boxes_ref[2]
    ph = boxes_ref[3]
    pa = boxes_ref[4]

    tx = boxes_ref[5]
    ty = boxes_ref[6]
    tw = boxes_ref[7]
    th = boxes_ref[8]
    ta = boxes_ref[9]

    dx = px - tx
    dy = py - ty
    da = pa - ta

    cos_t = jnp.cos(ta)
    sin_t = jnp.sin(ta)
    sin_d = jnp.sin(da)
    sin_d2 = sin_d * sin_d
    cos_d2 = 1.0 - sin_d2          # exact identity, saves one trig (EUP)

    tw2 = tw * tw
    th2 = th * th
    pw2 = pw * pw
    ph2 = ph * ph

    inv_tw2 = 1.0 / tw2            # exact divides kept for the 1e-5 tolerance
    inv_th2 = 1.0 / th2

    a1 = dx * cos_t + dy * sin_t
    a2 = dy * cos_t - dx * sin_t
    term1 = 2.0 * (a1 * a1 * inv_tw2 + a2 * a2 * inv_th2)

    term2 = 0.5 * (sin_d2 * (ph2 * inv_tw2 + pw2 * inv_th2)
                   + cos_d2 * (ph2 * inv_th2 + pw2 * inv_tw2))

    # 0.5*(log(th2/ph2) + log(tw2/pw2)) == log(th*tw) - log(ph*pw) for w,h > 0.
    # Split-log form drops one full f32 divide from the VALU; the extra log
    # lands on the EUP slot, which has large slack here (v7x VALU relief).
    term3 = jnp.log(th * tw) - jnp.log(ph * pw)

    kld = term1 + term2 + term3 - 1.0
    loss = 1.0 - 1.0 / (taf + jnp.log(kld + 1.0))
    out_ref[...] = loss * loss_weight


def _round_up(x, m):
    return ((x + m - 1) // m) * m


def kld_loss_pallas(pred, target, taf=1.0, loss_weight=1.0):
    """pred, target: (..., 5) arrays of rotated boxes. Returns per-box loss (N,)."""
    assert pred.shape[0] == target.shape[0]
    pred = jnp.reshape(pred, (-1, 5)).astype(jnp.float32)
    target = jnp.reshape(target, (-1, 5)).astype(jnp.float32)
    n = pred.shape[0]
    if n == 0:
        return jnp.zeros((0,), jnp.float32)

    # --- tiling: pad-to-block (never shrink to tiny blocks) ------------------
    rows_needed = pl.cdiv(n, _LANE)
    rows_rounded = _round_up(rows_needed, _SUBLANE)

    # At least 2 grid steps whenever there is enough work, so the "parallel"
    # axis actually shards across v7x's two TensorCores (neutral on the
    # single-TC v5e/v6e).
    min_steps = 2 if rows_rounded >= 2 * _SUBLANE else 1
    num_steps = max(min_steps, pl.cdiv(rows_rounded, _MAX_BLOCK_ROWS))
    block_rows = _round_up(pl.cdiv(rows_rounded, num_steps), _SUBLANE)
    rows_total = num_steps * block_rows            # waste <= 8 rows per step
    n_pad = rows_total * _LANE
    grid = (num_steps,)

    # --- layout: one component-major, lane-dense slab ------------------------
    # Stack pred+target into a single (n_pad, 10) array so XLA does one fused
    # concat+pad+transpose, then reshape to (10, rows_total, LANE): every
    # plane the kernel touches is a fully lane+sublane-dense vreg tile.
    # Padded boxes use 1.0 everywhere (w=h=1, pred==target -> finite loss,
    # discarded by the final slice).
    # TODO(synk): for very large N the producer should ideally emit the
    # component-major (10, N) layout directly so this transpose disappears.
    boxes = jnp.concatenate([pred, target], axis=1)             # (n, 10)
    boxes = jnp.pad(boxes, ((0, n_pad - n), (0, 0)), constant_values=1.0)
    boxes = boxes.T.reshape(10, rows_total, _LANE)

    kernel = functools.partial(_kld_kernel, taf=float(taf),
                               loss_weight=float(loss_weight))

    out = pl.pallas_call(
        kernel,
        out_shape=jax.ShapeDtypeStruct((rows_total, _LANE), jnp.float32),
        grid_spec=pltpu.PrefetchScalarGridSpec(
            num_scalar_prefetch=0,
            grid=grid,
            in_specs=[
                pl.BlockSpec((10, block_rows, _LANE), lambda i: (0, i, 0)),
            ],
            out_specs=pl.BlockSpec((block_rows, _LANE), lambda i: (i, 0)),
        ),
        compiler_params=pltpu.CompilerParams(
            dimension_semantics=("parallel",),
            # Hint: allow XLA to fuse the concat/pad/transpose producer into
            # the pallas-call input (declined harmlessly if unsupported).
            allow_input_fusion=[True],
        ),
    )(boxes)

    return out.reshape(-1)[:n]


class KLDloss:
    """JAX/Pallas equivalent of the PyTorch KLDloss module (reduction='none')."""

    def __init__(self, taf=1.0, reduction="none", loss_weight=1.0):
        self.taf = taf
        self.reduction = reduction
        self.loss_weight = loss_weight

    def __call__(self, pred, target):
        return kld_loss_pallas(pred, target, taf=self.taf,
                               loss_weight=self.loss_weight)


def _reference(pred, target, taf=1.0, loss_weight=1.0):
    pred = jnp.reshape(pred, (-1, 5)).astype(jnp.float32)
    target = jnp.reshape(target, (-1, 5)).astype(jnp.float32)
    dx = pred[:, 0] - target[:, 0]
    dy = pred[:, 1] - target[:, 1]
    da = pred[:, 4] - target[:, 4]
    ta = target[:, 4]
    kld = (0.5 * (4 * (dx * jnp.cos(ta) + dy * jnp.sin(ta)) ** 2 / target[:, 2] ** 2
                  + 4 * (dy * jnp.cos(ta) - dx * jnp.sin(ta)) ** 2 / target[:, 3] ** 2)
           + 0.5 * (pred[:, 3] ** 2 / target[:, 2] ** 2 * jnp.sin(da) ** 2
                    + pred[:, 2] ** 2 / target[:, 3] ** 2 * jnp.sin(da) ** 2
                    + pred[:, 3] ** 2 / target[:, 3] ** 2 * jnp.cos(da) ** 2
                    + pred[:, 2] ** 2 / target[:, 2] ** 2 * jnp.cos(da) ** 2)
           + 0.5 * (jnp.log(target[:, 3] ** 2 / pred[:, 3] ** 2)
                    + jnp.log(target[:, 2] ** 2 / pred[:, 2] ** 2))
           - 1.0)
    return (1 - 1 / (taf + jnp.log(kld + 1))) * loss_weight


if __name__ == "__main__":
    key = jax.random.PRNGKey(0)
    k1, k2, k3, k4 = jax.random.split(key, 4)
    n = 8  # number of rotated boxes

    # Boxes: [x, y, w, h, angle]; keep w/h strictly positive.
    pred = jnp.concatenate(
        [jax.random.normal(k1, (n, 2)) * 2.0,
         jax.random.uniform(k2, (n, 2), minval=1.0, maxval=4.0),
         jax.random.uniform(k3, (n, 1), minval=-1.0, maxval=1.0)], axis=1)
    target = jnp.concatenate(
        [pred[:, :2] + 0.3 * jax.random.normal(k4, (n, 2)),
         jax.random.uniform(k2, (n, 2), minval=1.5, maxval=3.5),
         jax.random.uniform(k1, (n, 1), minval=-1.0, maxval=1.0)], axis=1)

    loss_mod = KLDloss(taf=1.0, reduction="none", loss_weight=1.0)
    out = loss_mod(pred, target)
    jax.block_until_ready(out)

    ref = _reference(pred, target)
    assert out.shape == (n,)
    assert jnp.allclose(out, ref, rtol=1e-5, atol=1e-5), (out, ref)
    print("KERNEL_OK")
</pallas_src>

<mosaic_0001>
module attributes {stable_mosaic.version = 11 : i64} {
  func.func @_kld_kernel(%arg0: i32, %arg1: memref<10x8x512xf32, #tpu.memory_space<vmem>>, %arg2: memref<8x512xf32, #tpu.memory_space<vmem>>) attributes {dimension_semantics = [#tpu.dimension_semantics<parallel>], iteration_bounds = array<i64: 1>, scalar_prefetch = 0 : i64, scratch_operands = 0 : i64, tpu.core_type = #tpu.core_type<tc>, window_params = [{transform_indices = @transform_0, window_bounds = array<i64: 10, 8, 512>}, {transform_indices = @transform_1, window_bounds = array<i64: 8, 512>}]} {
    %c0 = arith.constant 0 : index
    %c0_0 = arith.constant 0 : index
    %c0_1 = arith.constant 0 : index
    %0 = vector.load %arg1[%c0, %c0_0, %c0_1] : memref<10x8x512xf32, #tpu.memory_space<vmem>>, vector<1x8x512xf32>
    %1 = vector.shape_cast %0 : vector<1x8x512xf32> to vector<8x512xf32>
    %c1 = arith.constant 1 : index
    %c0_2 = arith.constant 0 : index
    %c0_3 = arith.constant 0 : index
    %2 = vector.load %arg1[%c1, %c0_2, %c0_3] : memref<10x8x512xf32, #tpu.memory_space<vmem>>, vector<1x8x512xf32>
    %3 = vector.shape_cast %2 : vector<1x8x512xf32> to vector<8x512xf32>
    %c2 = arith.constant 2 : index
    %c0_4 = arith.constant 0 : index
    %c0_5 = arith.constant 0 : index
    %4 = vector.load %arg1[%c2, %c0_4, %c0_5] : memref<10x8x512xf32, #tpu.memory_space<vmem>>, vector<1x8x512xf32>
    %5 = vector.shape_cast %4 : vector<1x8x512xf32> to vector<8x512xf32>
    %c3 = arith.constant 3 : index
    %c0_6 = arith.constant 0 : index
    %c0_7 = arith.constant 0 : index
    %6 = vector.load %arg1[%c3, %c0_6, %c0_7] : memref<10x8x512xf32, #tpu.memory_space<vmem>>, vector<1x8x512xf32>
    %7 = vector.shape_cast %6 : vector<1x8x512xf32> to vector<8x512xf32>
    %c4 = arith.constant 4 : index
    %c0_8 = arith.constant 0 : index
    %c0_9 = arith.constant 0 : index
    %8 = vector.load %arg1[%c4, %c0_8, %c0_9] : memref<10x8x512xf32, #tpu.memory_space<vmem>>, vector<1x8x512xf32>
    %9 = vector.shape_cast %8 : vector<1x8x512xf32> to vector<8x512xf32>
    %c5 = arith.constant 5 : index
    %c0_10 = arith.constant 0 : index
    %c0_11 = arith.constant 0 : index
    %10 = vector.load %arg1[%c5, %c0_10, %c0_11] : memref<10x8x512xf32, #tpu.memory_space<vmem>>, vector<1x8x512xf32>
    %11 = vector.shape_cast %10 : vector<1x8x512xf32> to vector<8x512xf32>
    %c6 = arith.constant 6 : index
    %c0_12 = arith.constant 0 : index
    %c0_13 = arith.constant 0 : index
    %12 = vector.load %arg1[%c6, %c0_12, %c0_13] : memref<10x8x512xf32, #tpu.memory_space<vmem>>, vector<1x8x512xf32>
    %13 = vector.shape_cast %12 : vector<1x8x512xf32> to vector<8x512xf32>
    %c7 = arith.constant 7 : index
    %c0_14 = arith.constant 0 : index
    %c0_15 = arith.constant 0 : index
    %14 = vector.load %arg1[%c7, %c0_14, %c0_15] : memref<10x8x512xf32, #tpu.memory_space<vmem>>, vector<1x8x512xf32>
    %15 = vector.shape_cast %14 : vector<1x8x512xf32> to vector<8x512xf32>
    %c8 = arith.constant 8 : index
    %c0_16 = arith.constant 0 : index
    %c0_17 = arith.constant 0 : index
    %16 = vector.load %arg1[%c8, %c0_16, %c0_17] : memref<10x8x512xf32, #tpu.memory_space<vmem>>, vector<1x8x512xf32>
    %17 = vector.shape_cast %16 : vector<1x8x512xf32> to vector<8x512xf32>
    %c9 = arith.constant 9 : index
    %c0_18 = arith.constant 0 : index
    %c0_19 = arith.constant 0 : index
    %18 = vector.load %arg1[%c9, %c0_18, %c0_19] : memref<10x8x512xf32, #tpu.memory_space<vmem>>, vector<1x8x512xf32>
    %19 = vector.shape_cast %18 : vector<1x8x512xf32> to vector<8x512xf32>
    %20 = arith.subf %1, %11 : vector<8x512xf32>
    %21 = arith.subf %3, %13 : vector<8x512xf32>
    %22 = arith.subf %9, %19 : vector<8x512xf32>
    %23 = math.cos %19 : vector<8x512xf32>
    %24 = math.sin %19 : vector<8x512xf32>
    %25 = math.sin %22 : vector<8x512xf32>
    %26 = arith.mulf %25, %25 : vector<8x512xf32>
    %cst = arith.constant 1.000000e+00 : f32
    %27 = vector.broadcast %cst : f32 to vector<8x512xf32>
    %28 = arith.subf %27, %26 : vector<8x512xf32>
    %29 = arith.mulf %15, %15 : vector<8x512xf32>
    %30 = arith.mulf %17, %17 : vector<8x512xf32>
    %31 = arith.mulf %5, %5 : vector<8x512xf32>
    %32 = arith.mulf %7, %7 : vector<8x512xf32>
    %cst_20 = arith.constant 1.000000e+00 : f32
    %33 = vector.broadcast %cst_20 : f32 to vector<8x512xf32>
    %34 = arith.divf %33, %29 : vector<8x512xf32>
    %cst_21 = arith.constant 1.000000e+00 : f32
    %35 = vector.broadcast %cst_21 : f32 to vector<8x512xf32>
    %36 = arith.divf %35, %30 : vector<8x512xf32>
    %37 = arith.mulf %20, %23 : vector<8x512xf32>
    %38 = arith.mulf %21, %24 : vector<8x512xf32>
    %39 = arith.addf %37, %38 : vector<8x512xf32>
    %40 = arith.mulf %21, %23 : vector<8x512xf32>
    %41 = arith.mulf %20, %24 : vector<8x512xf32>
    %42 = arith.subf %40, %41 : vector<8x512xf32>
    %43 = arith.mulf %39, %39 : vector<8x512xf32>
    %44 = arith.mulf %43, %34 : vector<8x512xf32>
    %45 = arith.mulf %42, %42 : vector<8x512xf32>
    %46 = arith.mulf %45, %36 : vector<8x512xf32>
    %47 = arith.addf %44, %46 : vector<8x512xf32>
    %cst_22 = arith.constant 2.000000e+00 : f32
    %48 = vector.broadcast %cst_22 : f32 to vector<8x512xf32>
    %49 = arith.mulf %48, %47 : vector<8x512xf32>
    %50 = arith.mulf %32, %34 : vector<8x512xf32>
    %51 = arith.mulf %31, %36 : vector<8x512xf32>
    %52 = arith.addf %50, %51 : vector<8x512xf32>
    %53 = arith.mulf %26, %52 : vector<8x512xf32>
    %54 = arith.mulf %32, %36 : vector<8x512xf32>
    %55 = arith.mulf %31, %34 : vector<8x512xf32>
    %56 = arith.addf %54, %55 : vector<8x512xf32>
    %57 = arith.mulf %28, %56 : vector<8x512xf32>
    %58 = arith.addf %53, %57 : vector<8x512xf32>
    %cst_23 = arith.constant 5.000000e-01 : f32
    %59 = vector.broadcast %cst_23 : f32 to vector<8x512xf32>
    %60 = arith.mulf %59, %58 : vector<8x512xf32>
    %61 = arith.mulf %17, %15 : vector<8x512xf32>
    %62 = math.log %61 : vector<8x512xf32>
    %63 = arith.mulf %7, %5 : vector<8x512xf32>
    %64 = math.log %63 : vector<8x512xf32>
    %65 = arith.subf %62, %64 : vector<8x512xf32>
    %66 = arith.addf %49, %60 : vector<8x512xf32>
    %67 = arith.addf %66, %65 : vector<8x512xf32>
    %cst_24 = arith.constant 1.000000e+00 : f32
    %68 = vector.broadcast %cst_24 : f32 to vector<8x512xf32>
    %69 = arith.subf %67, %68 : vector<8x512xf32>
    %cst_25 = arith.constant 1.000000e+00 : f32
    %70 = vector.broadcast %cst_25 : f32 to vector<8x512xf32>
    %71 = arith.addf %69, %70 : vector<8x512xf32>
    %72 = math.log %71 : vector<8x512xf32>
    %cst_26 = arith.constant 1.000000e+00 : f32
    %73 = vector.broadcast %cst_26 : f32 to vector<8x512xf32>
    %74 = arith.addf %73, %72 : vector<8x512xf32>
    %cst_27 = arith.constant 1.000000e+00 : f32
    %75 = vector.broadcast %cst_27 : f32 to vector<8x512xf32>
    %76 = arith.divf %75, %74 : vector<8x512xf32>
    %cst_28 = arith.constant 1.000000e+00 : f32
    %77 = vector.broadcast %cst_28 : f32 to vector<8x512xf32>
    %78 = arith.subf %77, %76 : vector<8x512xf32>
    %cst_29 = arith.constant 1.000000e+00 : f32
    %79 = vector.broadcast %cst_29 : f32 to vector<8x512xf32>
    %80 = arith.mulf %78, %79 : vector<8x512xf32>
    %c0_30 = arith.constant 0 : index
    %c0_31 = arith.constant 0 : index
    %81 = vector.load %arg2[%c0_30, %c0_31] : memref<8x512xf32, #tpu.memory_space<vmem>>, vector<8x512xf32>
    tpu.vector_store %arg2[%c0_30, %c0_31], %80 {strides = array<i32>} : memref<8x512xf32, #tpu.memory_space<vmem>>, vector<8x512xf32>,
    return
  }
  func.func @transform_0(%arg0: i32) -> (i32, i32, i32) {
    %c0_i32 = arith.constant 0 : i32
    %c0_i32_0 = arith.constant 0 : i32
    %c0_i32_1 = arith.constant 0 : i32
    return %c0_i32, %arg0, %c0_i32_0 : i32, i32, i32
  }
  func.func @transform_1(%arg0: i32) -> (i32, i32) {
    %c0_i32 = arith.constant 0 : i32
    %c0_i32_0 = arith.constant 0 : i32
    return %arg0, %c0_i32 : i32, i32
  }
}

</mosaic_0001>

<bundles_post_ra>
// kernel: tpu_custom_call.1
= control target key start
LH: loop header
LB: loop body
LE: loop exit
PB: predicated region body
PF: predicated region fallthrough
CT: control target
= control target key end

     0   :  { %6 = vsyncpa [#allocation3], 0  ;;  %s2823_s0 = inlined_call_operand.hbm [shape: f32[10,8,512], index: 0, kind: input, shape index: {}]   ;;  %s2824_s1 = inlined_call_operand.hbm [shape: f32[8,512], index: 1, kind: output, shape index: {}]  }
   0x1   :  { %7 = vsyncpa [#allocation4], 0  ;;  %s1764_s6 = smov [#allocation2]  }
   0x2   :  { %s13_s7 = sshll.u32 %s1764_s6, 4  ;;  %s14_s7 = int_to_ptr.vmem [resolvable:$true] %s13_s7 }
   0x3   :  { %s1728_s8 = scalar_lea.vmem %s14_s7, 5120  ;;  %p1733_p1 = scmp.lt.s32.totalorder %s14_s7, %s14_s7 }
   0x4   :  { %p1729_p0 = scmp.ne.s32.totalorder %s14_s7, %s1728_s8  ;;  %p1734_p2 = scmp.lt.s32.totalorder %s1728_s8, %s1728_s8 }
   0x6   :  { %p1735_p3 = por %p1734_p2, %p1733_p1 }
   0x8   :  { %p1736_p4 = pnand %p1735_p3, %p1729_p0 }
   0xa   :  { %1739 = shalt.err (!%p1736_p4)
}
   0xb   :  { %s1765_s9 = smov 512   ;;  %s1766_s10 = smov 32  }
   0xc   :  { %19 = dma.hbm_to_vmem [thread:$0]  %s2823_s0, 5120, %s14_s7, [#allocation3], %s1765_s9, %s1765_s9, %s1766_s10  }
   0xd   :  { %1760 = dma.done.wait [#allocation3], 5120  }
   0xe   :  { %1761 = vsyncadd [#allocation3], 4294962176  ;;  %v1787_v0 = vld [vmem:[#allocation2 + $0x120] sm:$0xff]  ;;  %v1789_v1 = vld [vmem:[#allocation2 + $0x128] sm:$0xff]  ;;  %v2833_v27 = vmov 683565275  }
   0xf   :  { %v84_v2 = vand.u32 2147483647, %v1787_v0  ;;  %v87_v3 = vand.u32 2139095040, %v1787_v0  ;;  %v1793_v4 = vld [vmem:[#allocation2 + $0x130] sm:$0xff]  ;;  %v187_v5 = vand.u32 2147483647, %v1789_v1 }
  0x10   :  { %v190_v7 = vand.u32 2139095040, %v1789_v1  ;;  %v293_v12 = vand.u32 2139095040, %v1793_v4  ;;  %v1768_v29 = vmov 2475754826   ;;  %v1769_v31 = vmov 2131351028  }
  0x11   :  { %v88_v6 = vshrl.u32 %v87_v3, 23  ;;  %v91_v8 = vand.u32 8388607, %v84_v2  ;;  %v194_v9 = vand.u32 8388607, %v187_v5  ;;  %s1773_s0 = smov [#allocation5]  }
  0x12   :  { %v191_v11 = vshrl.u32 %v190_v7, 23  ;;  %v294_v15 = vshrl.u32 %v293_v12, 23  ;;  %v1770_v33 = vmov 2102212464   ;;  %v2829_v35 = vmov 920167782  }
  0x13   :  { %v1543_v10 = vadd.s32 4294967169, %v88_v6  ;;  %v92_v16 = vor.u32 8388608, %v91_v8  ;;  %v195_v17 = vor.u32 8388608, %v194_v9  ;;  %v2826_v43 = vmov 1326507024   ;;  %s1534_s13 = sshll.u32 %s1773_s0, 4  ;;  %s1535_s13 = int_to_ptr.vmem [resolvable:$true] %s1534_s13 }
  0x14   :  { %v1547_v14 = vadd.s32 4294967169, %v191_v11  ;;  %v1551_v19 = vadd.s32 4294967169, %v294_v15  ;;  %s1740_s14 = scalar_lea.vmem %s1535_s13, 512  ;;  %p1745_p6 = scmp.lt.s32.totalorder %s1535_s13, %s1535_s13 }
  0x15   :  { %v94_v13 = vadd.s32 1, %v1543_v10  ;;  %v1802_v23 = vshll.u32 %v92_v16, 8  ;;  %v1804_v24 = vshll.u32 %v195_v17, 8  ;;  %p1741_p5 = scmp.ne.s32.totalorder %s1535_s13, %s1740_s14  ;;  %p1746_p7 = scmp.lt.s32.totalorder %s1740_s14, %s1740_s14 }
  0x16   :  { %v197_v18 = vadd.s32 1, %v1547_v14  ;;  %v1806_v25 = vadd.s32 1, %v1551_v19 }
  0x17   :  { %vm95_vm0 = vcmp.gt.s32.totalorder %v94_v13, 0  ;;  %p1747_p8 = por %p1746_p7, %p1745_p6 }
  0x18   :  { %v96_v20 = vsel %vm95_vm0, %v94_v13, 0  ;;  %vm198_vm1 = vcmp.gt.s32.totalorder %v197_v18, 0  ;;  %vm301_vm8 = vcmp.gt.s32.totalorder %v1806_v25, 0 }
  0x19   :  { %v97_v21 = vshrl.u32 %v96_v20, 5  ;;  %v98_v22 = vand.u32 31, %v96_v20  ;;  %v199_v37 = vsel %vm198_vm1, %v197_v18, 0  ;;  %p1748_p9 = pnand %p1747_p8, %p1741_p5 }
  0x1a   :  { %v200_v50 = vshrl.u32 %v199_v37, 5  ;;  %v201_v51 = vand.u32 31, %v199_v37 }
  0x1b   :  { %v99_v26 = vsub.s32 32, %v98_v22  ;;  %v101_v28 = vshll.u32 %v2833_v27, %v98_v22  ;;  %v104_v30 = vshll.u32 %v1768_v29, %v98_v22  ;;  %v107_v32 = vshll.u32 %v1769_v31, %v98_v22 }
  0x1c   :  { %v110_v34 = vshll.u32 %v1770_v33, %v98_v22  ;;  %v113_v36 = vshll.u32 %v2829_v35, %v98_v22  ;;  %vm116_vm2 = vcmp.lt.s32.totalorder %v97_v21, 1  ;;  %vm117_vm3 = vcmp.lt.s32.totalorder %v97_v21, 2 }
  0x1d   :  { %v100_v38 = vshrl.u32 %v2833_v27, %v99_v26  ;;  %v102_v39 = vshrl.u32 %v1768_v29, %v99_v26  ;;  %v105_v40 = vshrl.u32 %v1769_v31, %v99_v26  ;;  %v108_v41 = vshrl.u32 %v1770_v33, %v99_v26 }
  0x1e   :  { %v111_v42 = vshrl.u32 %v2829_v35, %v99_v26  ;;  %v114_v44 = vshrl.u32 %v2826_v43, %v99_v26  ;;  %vm118_vm4 = vcmp.lt.s32.totalorder %v97_v21, 3  ;;  %vm119_vm5 = vcmp.lt.s32.totalorder %v97_v21, 4 }
  0x1f   :  { %v103_v45 = vor.u32 %v102_v39, %v101_v28  ;;  %v106_v46 = vor.u32 %v105_v40, %v104_v30  ;;  %v109_v47 = vor.u32 %v108_v41, %v107_v32  ;;  %v202_v59 = vsub.s32 32, %v201_v51 }
  0x20   :  { %v112_v48 = vor.u32 %v111_v42, %v110_v34  ;;  %v115_v49 = vor.u32 %v114_v44, %v113_v36  ;;  %v204_v63 = vshll.u32 %v2833_v27, %v201_v51  ;;  %v207_v14 = vshll.u32 %v1768_v29, %v201_v51 }
  0x21   :  { %v120_v52 = vsel %vm116_vm2, %v100_v38, %v103_v45  ;;  %v121_v53 = vsel %vm119_vm5, %v109_v47, 2102212464  ;;  %v124_v54 = vsel %vm116_vm2, %v103_v45, %v106_v46  ;;  %v128_v55 = vsel %vm116_vm2, %v106_v46, %v109_v47 }
  0x22   :  { %v122_v56 = vsel %vm118_vm4, %v106_v46, %v121_v53  ;;  %v125_v57 = vsel %vm119_vm5, %v112_v48, 920167782  ;;  %v129_v58 = vsel %vm119_vm5, %v115_v49, 1326507024  ;;  %v203_v8 = vshrl.u32 %v2833_v27, %v202_v59 }
  0x23   :  { %v123_v60 = vsel %vm117_vm3, %v120_v52, %v122_v56  ;;  %v126_v61 = vsel %vm118_vm4, %v109_v47, %v125_v57  ;;  %v130_v62 = vsel %vm118_vm4, %v112_v48, %v129_v58  ;;  %v205_v13 = vshrl.u32 %v1768_v29, %v202_v59 }
  0x24   :  { %v127_v3 = vsel %vm117_vm3, %v124_v54, %v126_v61  ;;  %v131_v6 = vsel %vm117_vm3, %v128_v55, %v130_v62  ;;  %v139_v7 = vmul.u32 %v1802_v23, %v123_v60  ;;  %v208_v15 = vshrl.u32 %v1769_v31, %v202_v59 }
  0x25   :  { %v1833_v9 = vmul.u32.u64.low %v1802_v23, %v131_v6  ;;  %v1834_v10 = vmul.u32.u64.high %v1802_v23, %v131_v6, %v1833_v9  ;;  %v1837_v11 = vmul.u32.u64.low %v1802_v23, %v127_v3  ;;  %v1838_v12 = vmul.u32.u64.high %v1802_v23, %v127_v3, %v1837_v11 }
  0x26   :  { %v210_v16 = vshll.u32 %v1769_v31, %v201_v51  ;;  %v211_v17 = vshrl.u32 %v1770_v33, %v202_v59  ;;  %v213_v18 = vshll.u32 %v1770_v33, %v201_v51  ;;  %v214_v19 = vshrl.u32 %v2829_v35, %v202_v59 }
  0x27   :  { %v216_v20 = vshll.u32 %v2829_v35, %v201_v51  ;;  %v206_v21 = vor.u32 %v205_v13, %v204_v63  ;;  %v209_v22 = vor.u32 %v208_v15, %v207_v14  ;;  %v217_v23 = vshrl.u32 %v2826_v43, %v202_v59  ;;  %v1862_v51 = vld [vmem:[#allocation2 + $0x138] sm:$0xff] }
  0x28   :  { %vm219_vm6 = vcmp.lt.s32.totalorder %v200_v50, 1  ;;  %vm141_vm7 = vc.u32 %v1834_v10, %v1837_v11  ;;  %v142_v26 = vadd.s32 1, %v1838_v12  ;;  %v212_v28 = vor.u32 %v211_v17, %v210_v16 }
  0x29   :  { %v215_v30 = vor.u32 %v214_v19, %v213_v18  ;;  %v218_v32 = vor.u32 %v217_v23, %v216_v20  ;;  %vm220_vm9 = vcmp.lt.s32.totalorder %v200_v50, 2  ;;  %vm221_vm10 = vcmp.lt.s32.totalorder %v200_v50, 3 }
  0x2a   :  { %v143_v34 = vsel %vm141_vm7, %v142_v26, %v1838_v12  ;;  %vm222_vm11 = vcmp.lt.s32.totalorder %v200_v50, 4  ;;  %v223_v36 = vsel %vm219_vm6, %v203_v8, %v206_v21  ;;  %v227_v37 = vsel %vm219_vm6, %v206_v21, %v209_v22 }
  0x2b   :  { %v144_v38 = vadd.s32 %v143_v34, %v139_v7  ;;  %v224_v39 = vsel %vm222_vm11, %v212_v28, 2102212464  ;;  %v228_v40 = vsel %vm222_vm11, %v215_v30, 920167782  ;;  %v231_v41 = vsel %vm219_vm6, %v209_v22, %v212_v28 }
  0x2c   :  { %v225_v42 = vsel %vm221_vm10, %v209_v22, %v224_v39  ;;  %v229_v44 = vsel %vm221_vm10, %v212_v28, %v228_v40  ;;  %v232_v45 = vsel %vm222_vm11, %v218_v32, 1326507024  ;;  %v302_v49 = vsel %vm301_vm8, %v1806_v25, 0 }
  0x2d   :  { %v145_v46 = vadd.s32 536870912, %v144_v38  ;;  %v230_v47 = vsel %vm220_vm9, %v227_v37, %v229_v44  ;;  %v233_v48 = vsel %vm221_vm10, %v215_v30, %v232_v45  ;;  %v226_v52 = vsel %vm220_vm9, %v223_v36, %v225_v42 }
  0x2e   :  { %v234_v53 = vsel %vm220_vm9, %v231_v41, %v233_v48  ;;  %v1867_v54 = vmul.u32.u64.low %v1804_v24, %v230_v47  ;;  %v1868_v55 = vmul.u32.u64.high %v1804_v24, %v230_v47, %v1867_v54  ;;  %v290_v59 = vand.u32 2147483647, %v1793_v4 }
  0x2f   :  { %v1871_v56 = vshrl.u32 %v145_v46, 30  ;;  %v1874_v57 = vmul.u32.u64.low %v1804_v24, %v234_v53  ;;  %v1875_v58 = vmul.u32.u64.high %v1804_v24, %v234_v53, %v1874_v57  ;;  %v304_v25 = vand.u32 31, %v302_v49 }
  0x30   :  { %v242_v61 = vmul.u32 %v1804_v24, %v226_v52  ;;  %v396_v50 = vand.u32 2139095040, %v1862_v51  ;;  %v245_v62 = vadd.s32 1, %v1868_v55  ;;  %v297_v7 = vand.u32 8388607, %v290_v59 }
  0x31   :  { %v147_v60 = vshll.u32 %v1871_v56, 30  ;;  %v305_v63 = vsub.s32 32, %v304_v25  ;;  %vm244_vm12 = vc.u32 %v1875_v58, %v1867_v54  ;;  %v303_v12 = vshrl.u32 %v302_v49, 5 }
  0x32   :  { %v246_v6 = vsel %vm244_vm12, %v245_v62, %v1868_v55  ;;  %v397_v24 = vshrl.u32 %v396_v50, 23  ;;  %v307_v13 = vshll.u32 %v2833_v27, %v304_v25  ;;  %v310_v15 = vshll.u32 %v1768_v29, %v304_v25 }
  0x33   :  { %v1882_v3 = vsub.s32 %v144_v38, %v147_v60  ;;  %v247_v9 = vadd.s32 %v246_v6, %v242_v61  ;;  %v308_v14 = vshrl.u32 %v1768_v29, %v305_v63  ;;  %v316_v16 = vshll.u32 %v1770_v33, %v304_v25 }
  0x34   :  { %v311_v18 = vshrl.u32 %v1769_v31, %v305_v63  ;;  %v313_v19 = vshll.u32 %v1769_v31, %v304_v25  ;;  %v314_v20 = vshrl.u32 %v1770_v33, %v305_v63  ;;  %v298_v22 = vor.u32 8388608, %v297_v7 }
  0x35   :  { %v150_v8 = vsub.s32 0, %v1882_v3  ;;  %v248_v21 = vadd.s32 536870912, %v247_v9  ;;  %v317_v23 = vshrl.u32 %v2829_v35, %v305_v63  ;;  %v319_v28 = vshll.u32 %v2829_v35, %v304_v25 }
  0x36   :  { %v320_v30 = vshrl.u32 %v2826_v43, %v305_v63  ;;  %v1555_v32 = vadd.s32 4294967169, %v397_v24  ;;  %vm322_vm13 = vcmp.lt.s32.totalorder %v303_v12, 1  ;;  %vm325_vm14 = vcmp.lt.s32.totalorder %v303_v12, 4 }
  0x37   :  { %v1544_v17 = vmin.u32 %v150_v8, %v1882_v3  ;;  %v1901_v34 = vshrl.u32 %v248_v21, 30  ;;  %v318_v36 = vor.u32 %v317_v23, %v316_v16  ;;  %v309_v38 = vor.u32 %v308_v14, %v307_v13 }
  0x38   :  { %v312_v39 = vor.u32 %v311_v18, %v310_v15  ;;  %v315_v40 = vor.u32 %v314_v20, %v313_v19  ;;  %v321_v42 = vor.u32 %v320_v30, %v319_v28  ;;  %vm324_vm15 = vcmp.lt.s32.totalorder %v303_v12, 3 }
  0x39   :  { %v152_v26 = vclz %v1544_v17  ;;  %v250_v41 = vshll.u32 %v1901_v34, 30  ;;  %v331_v44 = vsel %vm325_vm14, %v318_v36, 920167782  ;;  %v403_v45 = vadd.s32 1, %v1555_v32 }
  0x3a   :  { %v306_v48 = vshrl.u32 %v2833_v27, %v305_v63  ;;  %vm323_vm1 = vcmp.lt.s32.totalorder %v303_v12, 2  ;;  %v327_v52 = vsel %vm325_vm14, %v315_v40, 2102212464  ;;  %v330_v53 = vsel %vm322_vm13, %v309_v38, %v312_v39 }
  0x3b   :  { %v1545_v37 = vadd.s32 4294967294, %v152_v26  ;;  %v1905_v47 = vsub.s32 %v247_v9, %v250_v41  ;;  %v332_v55 = vsel %vm324_vm15, %v315_v40, %v331_v44  ;;  %v334_v25 = vsel %vm322_vm13, %v312_v39, %v315_v40 }
  0x3c   :  { %v335_v60 = vsel %vm325_vm14, %v321_v42, 1326507024  ;;  %v338_v61 = vshll.u32 %v298_v22, 8  ;;  %v140_v50 = vadd.s32 %v1837_v11, %v1834_v10  ;;  %v393_v63 = vand.u32 2147483647, %v1862_v51 }
  0x3d   :  { %vm1546_vm0 = vcmp.lt.s32.totalorder %v1545_v37, 0  ;;  %v253_v57 = vsub.s32 0, %v1905_v47  ;;  %v336_v62 = vsel %vm324_vm15, %v318_v36, %v335_v60  ;;  %vm404_vm2 = vcmp.gt.s32.totalorder %v403_v45, 0 }
  0x3e   :  { %v155_v46 = vsel %vm1546_vm0, 0, %v1545_v37  ;;  %v326_v7 = vsel %vm322_vm13, %v306_v48, %v309_v38  ;;  %v328_v8 = vsel %vm324_vm15, %v312_v39, %v327_v52  ;;  %v333_v9 = vsel %vm323_vm1, %v330_v53, %v332_v55 }
  0x3f   :  { %v160_v49 = vsub.s32 4294967266, %v155_v46  ;;  %v1548_v6 = vmin.u32 %v253_v57, %v1905_v47  ;;  %v156_v24 = vsub.s32 32, %v155_v46  ;;  %v337_v14 = vsel %vm323_vm1, %v334_v25, %v336_v62 }
  0x40   :  { %v405_v15 = vsel %vm404_vm2, %v403_v45, 0  ;;  %v1923_v10 = vmul.u32.u64.low %v338_v61, %v337_v14  ;;  %v1924_v11 = vmul.u32.u64.high %v338_v61, %v337_v14, %v1923_v10  ;;  %v329_v17 = vsel %vm323_vm1, %v326_v7, %v328_v8 }
  0x41   :  { %v161_v13 = vadd.s32 127, %v160_v49  ;;  %v255_v16 = vclz %v1548_v6  ;;  %v1927_v18 = vmul.u32.u64.low %v338_v61, %v333_v9  ;;  %v1928_v19 = vmul.u32.u64.high %v338_v61, %v333_v9, %v1927_v18 }
  0x42   :  { %v400_v20 = vand.u32 8388607, %v393_v63  ;;  %v407_v22 = vand.u32 31, %v405_v15  ;;  %v157_v23 = vshll.u32 %v1882_v3, %v155_v46  ;;  %v158_v26 = vshrl.u32 %v140_v50, %v156_v24 }
  0x43   :  { %v1549_v21 = vadd.s32 4294967294, %v255_v16  ;;  %v162_v28 = vshll.u32 %v161_v13, 23  ;;  %v345_v30 = vmul.u32 %v338_v61, %v329_v17  ;;  %vm347_vm3 = vc.u32 %v1924_v11, %v1927_v18 }
  0x44   :  { %v408_v32 = vsub.s32 32, %v407_v22  ;;  %v348_v12 = vadd.s32 1, %v1928_v19  ;;  %v401_v36 = vor.u32 8388608, %v400_v20  ;;  %v159_v37 = vor.u32 %v158_v26, %v157_v23 }
  0x45   :  { %vm1550_vm4 = vcmp.lt.s32.totalorder %v1549_v21, 0  ;;  %v163_v38 = vor.u32 4788187, %v162_v28  ;;  %v406_v40 = vshrl.u32 %v405_v15, 5  ;;  %v410_v3 = vshll.u32 %v2833_v27, %v407_v22 }
  0x46   :  { %v349_v39 = vsel %vm347_vm3, %v348_v12, %v1928_v19  ;;  %v258_v41 = vsel %vm1550_vm4, 0, %v1549_v21  ;;  %v411_v44 = vshrl.u32 %v1768_v29, %v408_v32  ;;  %v413_v45 = vshll.u32 %v1768_v29, %v407_v22 }
  0x47   :  { %v350_v42 = vadd.s32 %v349_v39, %v345_v30  ;;  %v414_v46 = vshrl.u32 %v1769_v31, %v408_v32  ;;  %v1942_v48 = vshll.u32 %v401_v36, 8  ;;  %v243_v49 = vadd.s32 %v1867_v54, %v1875_v58 }
  0x48   :  { %v416_v53 = vshll.u32 %v1769_v31, %v407_v22  ;;  %v417_v55 = vshrl.u32 %v1770_v33, %v408_v32  ;;  %v164_v57 = vand.u32 2147483647, %v163_v38  ;;  %v166_v25 = vcvt.s32.f32 %v159_v37 }
  0x49   :  { %v351_v52 = vadd.s32 536870912, %v350_v42  ;;  %v263_v60 = vsub.s32 4294967266, %v258_v41  ;;  %v419_v61 = vshll.u32 %v1770_v33, %v407_v22  ;;  %v412_v62 = vor.u32 %v411_v44, %v410_v3  ;;  %v43_v3 = vld [vmem:[#allocation2 + $0x80] sm:$0xff] }
  0x4a   :  { %vm425_vm5 = vcmp.lt.s32.totalorder %v406_v40, 1  ;;  %vm427_vm6 = vcmp.lt.s32.totalorder %v406_v40, 3  ;;  %v415_v6 = vor.u32 %v414_v46, %v413_v45  ;;  %v420_v7 = vshrl.u32 %v2829_v35, %v408_v32 }
  0x4b   :  { %v1949_v50 = vshrl.u32 %v351_v52, 30  ;;  %v422_v54 = vshll.u32 %v2829_v35, %v407_v22  ;;  %v423_v58 = vshrl.u32 %v2826_v43, %v408_v32  ;;  %v259_v8 = vsub.s32 32, %v258_v41 }
  0x4c   :  { %v418_v24 = vor.u32 %v417_v55, %v416_v53  ;;  %vm428_vm7 = vcmp.lt.s32.totalorder %v406_v40, 4  ;;  %v167_v13 = vmul.f32 %v166_v25, %v164_v57  ;;  %v264_v14 = vadd.s32 127, %v263_v60 }
  0x4d   :  { %v353_v9 = vshll.u32 %v1949_v50, 30  ;;  %v421_v15 = vor.u32 %v420_v7, %v419_v61  ;;  %v424_v16 = vor.u32 %v423_v58, %v422_v54  ;;  %v260_v10 = vshll.u32 %v1905_v47, %v258_v41  ;;  %v23_v58 = vld [vmem:[#allocation2] sm:$0xff] }
  0x4e   :  { %v409_v19 = vshrl.u32 %v2833_v27, %v408_v32  ;;  %vm426_vm8 = vcmp.lt.s32.totalorder %v406_v40, 2  ;;  %v430_v20 = vsel %vm428_vm7, %v418_v24, 2102212464  ;;  %v433_v21 = vsel %vm425_vm5, %v412_v62, %v415_v6 }
  0x4f   :  { %v1956_v17 = vsub.s32 %v350_v42, %v353_v9  ;;  %v434_v22 = vsel %vm428_vm7, %v421_v15, 920167782  ;;  %v438_v23 = vsel %vm428_vm7, %v424_v16, 1326507024  ;;  %v261_v26 = vshrl.u32 %v243_v49, %v259_v8  ;;  %v24_v8 = vld [vmem:[#allocation2 + $0x8] sm:$0xff] }
  0x50   :  { %v435_v30 = vsel %vm427_vm6, %v418_v24, %v434_v22  ;;  %v437_v12 = vsel %vm425_vm5, %v415_v6, %v418_v24  ;;  %v168_v36 = vxor.u32 2147483648, %v167_v13  ;;  %v265_v37 = vshll.u32 %v264_v14, 23  ;;  %v48_v14 = vld [vmem:[#allocation2 + $0xa0] sm:$0xff]  ;;  %v49_v16 = vld [vmem:[#allocation2 + $0xa8] sm:$0xff] }
  0x51   :  { %v356_v28 = vsub.s32 0, %v1956_v17  ;;  %v439_v47 = vsel %vm427_vm6, %v421_v15, %v438_v23  ;;  %v429_v32 = vsel %vm425_vm5, %v409_v19, %v412_v62  ;;  %v431_v39 = vsel %vm427_vm6, %v415_v6, %v430_v20  ;;  %v51_v19 = vld [vmem:[#allocation2 + $0xb8] sm:$0xff]  ;;  %v28_v23 = vld [vmem:[#allocation2 + $0x20] sm:$0xff] }
  0x52   :  { %v436_v41 = vsel %vm426_vm8, %v433_v21, %v435_v30  ;;  %vm86_vm9 = vcmp.lt.s32.totalorder %v1787_v0, 0  ;;  %v440_v42 = vsel %vm426_vm8, %v437_v12, %v439_v47  ;;  %v262_v44 = vor.u32 %v261_v26, %v260_v10  ;;  %v50_v10 = vld [vmem:[#allocation2 + $0xb0] sm:$0xff]  ;;  %v29_v26 = vld [vmem:[#allocation2 + $0x28] sm:$0xff] }
  0x53   :  { %v1552_v38 = vmin.u32 %v356_v28, %v1956_v17  ;;  %v1971_v45 = vmul.u32.u64.low %v1942_v48, %v440_v42  ;;  %v1972_v46 = vmul.u32.u64.high %v1942_v48, %v440_v42, %v1971_v45  ;;  %v266_v49 = vor.u32 4788187, %v265_v37  ;;  %v30_v28 = vld [vmem:[#allocation2 + $0x30] sm:$0xff]  ;;  %v54_v37 = vld [vmem:[#allocation2 + $0xc8] sm:$0xff]  ;;  %v31_v42 = vld [vmem:[#allocation2 + $0x38] sm:$0xff] }
  0x54   :  { %v432_v52 = vsel %vm426_vm8, %v429_v32, %v431_v39  ;;  %v1976_v53 = vmul.u32.u64.low %v1942_v48, %v436_v41  ;;  %v1977_v55 = vmul.u32.u64.high %v1942_v48, %v436_v41, %v1976_v53  ;;  %vm1982_vm10 = vcmp.le.f32.partialorder %v84_v2, 0.7853982  ;;  %v55_v47 = vld [vmem:[#allocation2 + $0xd0] sm:$0xff] }
  0x55   :  { %v169_v25 = vsel %vm86_vm9, %v168_v36, %v167_v13  ;;  %v358_v60 = vclz %v1552_v38  ;;  %v1989_v61 = vsub.f32 %v43_v3, %v1787_v0  ;;  %v448_v40 = vmul.u32 %v1942_v48, %v432_v52  ;;  %v25_v13 = vld [vmem:[#allocation2 + $0x10] sm:$0xff]  ;;  %v26_v48 = vld [vmem:[#allocation2 + $0x18] sm:$0xff]  ;;  %v53_v36 = vld [vmem:[#allocation2 + $0xc0] sm:$0xff] }
  0x56   :  { %vm450_vm11 = vc.u32 %v1972_v46, %v1976_v53  ;;  %v172_v62 = vsel %vm1982_vm10, %v1787_v0, %v169_v25  ;;  %v267_v2 = vand.u32 2147483647, %v266_v49  ;;  %v269_v6 = vcvt.s32.f32 %v262_v44  ;;  %v56_v3 = vld [vmem:[#allocation2 + $0xd8] sm:$0xff] }
  0x57   :  { %v451_v7 = vadd.s32 1, %v1977_v55  ;;  %v1553_v54 = vadd.s32 4294967294, %v358_v60  ;;  %v915_v24 = vand.u32 2139095040, %v1989_v61  ;;  %1637 = vcosq.f32 %v172_v62 }
  0x58   :  { %1639 = vsinq.f32 %v172_v62  ;;  %v270_v20 = vmul.f32 %v269_v6, %v267_v2  ;;  %v170_v21 = vsub.s32 4, %v1871_v56  ;;  %v2001_v30 = vsub.f32 %v23_v58, %v48_v14  ;;  %v46_v14 = vld [vmem:[#allocation2 + $0x98] sm:$0xff] }
  0x59   :  { %v452_v9 = vsel %vm450_vm11, %v451_v7, %v1977_v55  ;;  %vm1554_vm12 = vcmp.lt.s32.totalorder %v1553_v54, 0  ;;  %v916_v12 = vshrl.u32 %v915_v24, 23  ;;  %v2003_v38 = vsub.f32 %v24_v8, %v49_v16  ;;  %v44_v7 = vld [vmem:[#allocation2 + $0x88] sm:$0xff] }
  0x5a   :  { %v453_v15 = vadd.s32 %v452_v9, %v448_v40  ;;  %v2005_v32 = vsub.f32 %v25_v13, %v50_v10  ;;  %v2007_v39 = vsub.f32 %v26_v48, %v51_v19  ;;  %v271_v44 = vxor.u32 2147483648, %v270_v20 }
  0x5b   :  { %v273_v45 = vsub.s32 4, %v1901_v34  ;;  %v361_v49 = vsel %vm1554_vm12, 0, %v1553_v54  ;;  %v1575_v52 = vadd.s32 4294967169, %v916_v12  ;;  %v171_v55 = vsel %vm86_vm9, %v170_v21, %v1871_v56  ;;  %v45_v54 = vld [vmem:[#allocation2 + $0x90] sm:$0xff] }
  0x5c   :  { %v454_v22 = vadd.s32 536870912, %v453_v15  ;;  %vm189_vm13 = vcmp.lt.s32.totalorder %v1789_v1, 0  ;;  %v376_v25 = vsub.s32 4, %v1949_v50  ;;  %v2019_v40 = vsub.f32 %v28_v23, %v53_v36 }
  0x5d   :  { %v2021_v62 = vsub.f32 %v29_v26, %v54_v37  ;;  %v2023_v2 = vsub.f32 %v30_v28, %v55_v47  ;;  %v922_v6 = vadd.s32 1, %v1575_v52  ;;  %v2025_v58 = vsub.f32 %v31_v42, %v56_v3 }
  0x5e   :  { %v2009_v41 = vshrl.u32 %v454_v22, 30  ;;  %vm2029_vm14 = vcmp.le.f32.partialorder %v187_v5, 0.7853982  ;;  %v366_v8 = vsub.s32 4294967266, %v361_v49  ;;  %v173_v24 = vsel %vm1982_vm10, 0, %v171_v55 }
  0x5f   :  { %2843 = vst [vmem:[#allocation8_spill] sm:$0xff] %v2025_v58  ;;  %v272_v13 = vsel %vm189_vm13, %v271_v44, %v270_v20  ;;  %v274_v48 = vsel %vm189_vm13, %v273_v45, %v1901_v34  ;;  %vm292_vm15 = vcmp.lt.s32.totalorder %v1793_v4, 0  ;;  %v346_v16 = vadd.s32 %v1927_v18, %v1924_v11 }
  0x60   :  { %v456_v60 = vshll.u32 %v2009_v41, 30  ;;  %v362_v10 = vsub.s32 32, %v361_v49  ;;  %v377_v5 = vsel %vm292_vm15, %v376_v25, %v1949_v50  ;;  %v2046_v19 = vsub.f32 %v44_v7, %v1789_v1 }
  0x61   :  { %v2049_v57 = vsub.f32 %v45_v54, %v1793_v4  ;;  %vm2053_vm0 = vcmp.le.f32.partialorder %v290_v59, 0.7853982  ;;  %vm923_vm1 = vcmp.gt.s32.totalorder %v922_v6, 0  ;;  %v275_v11 = vsel %vm2029_vm14, %v1789_v1, %v272_v13 }
  0x62   :  { %v2033_v9 = vsub.s32 %v453_v15, %v456_v60  ;;  %v367_v18 = vadd.s32 127, %v366_v8  ;;  %v2825_v20 = vand.u32 2147483647, %v1989_v61  ;;  %v2065_v22 = vsub.f32 %v46_v14, %v1862_v51 }
  0x63   :  { %v2069_v59 = vsel %vm2029_vm14, 0, %v274_v48  ;;  %v2073_v23 = vsel %vm2053_vm0, 0, %v377_v5  ;;  %v589_v26 = vadd.s32 3, %v173_v24  ;;  %v363_v28 = vshll.u32 %v1956_v17, %v361_v49 }
  0x64   :  { %v459_v15 = vsub.s32 0, %v2033_v9  ;;  %v2062_v21 = vpop.eup %1637  ;;  %v364_v12 = vshrl.u32 %v346_v16, %v362_v10  ;;  %v924_v37 = vsel %vm923_vm1, %v922_v6, 0  ;;  %v2078_v47 = vand.u32 3, %v173_v24 }
  0x65   :  { %v2075_v1 = vpop.eup %1639  ;;  %1641 = vcosq.f32 %v275_v11  ;;  %v2081_v42 = vand.u32 3, %v2069_v59  ;;  %v2084_v3 = vand.u32 3, %v2073_v23  ;;  %v368_v44 = vshll.u32 %v367_v18, 23 }
  0x66   :  { %v1556_v50 = vmin.u32 %v459_v15, %v2033_v9  ;;  %v919_v52 = vand.u32 8388607, %v2825_v20  ;;  %v926_v55 = vand.u32 31, %v924_v37  ;;  %v180_v17 = vxor.u32 2147483648, %v2075_v1 }
  0x67   :  { %v183_v49 = vxor.u32 2147483648, %v2062_v21  ;;  %1643 = vsinq.f32 %v275_v11  ;;  %v2090_v25 = vand.u32 3, %v589_v26  ;;  %v365_v60 = vor.u32 %v364_v12, %v363_v28 }
  0x68   :  { %v461_v36 = vclz %v1556_v50  ;;  %v925_v6 = vshrl.u32 %v924_v37, 5  ;;  %v927_v7 = vsub.s32 32, %v926_v55  ;;  %v929_v54 = vshll.u32 %v2833_v27, %v926_v55 }
  0x69   :  { %v932_v56 = vshll.u32 %v1768_v29, %v926_v55  ;;  %v935_v8 = vshll.u32 %v1769_v31, %v926_v55  ;;  %v938_v24 = vshll.u32 %v1770_v33, %v926_v55  ;;  %vm179_vm3 = vcmp.eq.s32.totalorder %v2078_v47, 0 }
  0x6a   :  { %v1557_v45 = vadd.s32 4294967294, %v461_v36  ;;  %vm182_vm4 = vcmp.eq.s32.totalorder %v2078_v47, 2  ;;  %v369_v13 = vor.u32 4788187, %v368_v44  ;;  %v920_v14 = vor.u32 8388608, %v919_v52 }
  0x6b   :  { %v941_v16 = vshll.u32 %v2829_v35, %v926_v55  ;;  %v930_v10 = vshrl.u32 %v1768_v29, %v927_v7  ;;  %v933_v5 = vshrl.u32 %v1769_v31, %v927_v7  ;;  %v936_v15 = vshrl.u32 %v1770_v33, %v927_v7 }
  0x6c   :  { %vm1558_vm2 = vcmp.lt.s32.totalorder %v1557_v45, 0  ;;  %v939_v11 = vshrl.u32 %v2829_v35, %v927_v7  ;;  %v372_v18 = vcvt.s32.f32 %v365_v60  ;;  %v928_v50 = vshrl.u32 %v2833_v27, %v927_v7 }
  0x6d   :  { %v2098_v48 = vsel %vm1558_vm2, 0, %v1557_v45  ;;  %v942_v26 = vshrl.u32 %v2826_v43, %v927_v7  ;;  %vm944_vm5 = vcmp.lt.s32.totalorder %v925_v6, 1  ;;  %vm178_vm6 = vcmp.lt.s32.totalorder %v2078_v47, 2 }
  0x6e   :  { %v931_v28 = vor.u32 %v930_v10, %v929_v54  ;;  %v934_v12 = vor.u32 %v933_v5, %v932_v56  ;;  %v937_v36 = vor.u32 %v936_v15, %v935_v8  ;;  %v940_v37 = vor.u32 %v939_v11, %v938_v24 }
  0x6f   :  { %v370_v44 = vand.u32 2147483647, %v369_v13  ;;  %v469_v45 = vsub.s32 4294967266, %v2098_v48  ;;  %v943_v52 = vor.u32 %v942_v26, %v941_v16  ;;  %v960_v55 = vshll.u32 %v920_v14, 8 }
  0x70   :  { %vm945_vm7 = vcmp.lt.s32.totalorder %v925_v6, 2  ;;  %vm946_vm8 = vcmp.lt.s32.totalorder %v925_v6, 3  ;;  %vm947_vm9 = vcmp.lt.s32.totalorder %v925_v6, 4  ;;  %v952_v60 = vsel %vm944_vm5, %v931_v28, %v934_v12 }
  0x71   :  { %v449_v7 = vadd.s32 %v1976_v53, %v1972_v46  ;;  %v948_v20 = vsel %vm944_vm5, %v928_v50, %v931_v28  ;;  %v949_v43 = vsel %vm947_vm9, %v937_v36, 2102212464  ;;  %v953_v54 = vsel %vm947_vm9, %v940_v37, 920167782 }
  0x72   :  { %vm2835_vm10 = vweird.f32 %v1787_v0  ;;  %v950_v56 = vsel %vm946_vm8, %v934_v12, %v949_v43  ;;  %v954_v8 = vsel %vm946_vm8, %v937_v36, %v953_v54  ;;  %v956_v24 = vsel %vm944_vm5, %v934_v12, %v937_v36  ;;  %v2117_v14 = vpop.eup %1641 }
  0x73   :  { %v957_v13 = vsel %vm947_vm9, %v943_v52, 1326507024  ;;  %vm285_vm11 = vcmp.eq.s32.totalorder %v2081_v42, 2  ;;  %v373_v16 = vmul.f32 %v372_v18, %v370_v44  ;;  %v465_v46 = vsub.s32 32, %v2098_v48 }
  0x74   :  { %v470_v53 = vadd.s32 127, %v469_v45  ;;  %v955_v10 = vsel %vm945_vm7, %v952_v60, %v954_v8  ;;  %v958_v5 = vsel %vm946_vm8, %v940_v37, %v957_v13  ;;  %v1019_v43 = vand.u32 2139095040, %v2046_v19  ;;  %v1644_v50 = vpop.eup %1643 }
  0x75   :  { %v2123_v15 = vmul.u32.u64.low %v960_v55, %v955_v10  ;;  %v2124_v11 = vmul.u32.u64.high %v960_v55, %v955_v10, %v2123_v15  ;;  %vm282_vm12 = vcmp.eq.s32.totalorder %v2081_v42, 0  ;;  %vm395_vm13 = vcmp.lt.s32.totalorder %v1862_v51, 0 }
  0x76   :  { %vm595_vm14 = vcmp.eq.s32.totalorder %v2090_v25, 2  ;;  %v693_v18 = vadd.s32 3, %v2069_v59  ;;  %v951_v26 = vsel %vm945_vm7, %v948_v20, %v950_v56  ;;  %v959_v28 = vsel %vm945_vm7, %v956_v24, %v958_v5 }
  0x77   :  { %v181_v12 = vsel %vm179_vm3, %v2062_v21, %v180_v17  ;;  %v184_v36 = vsel %vm182_vm4, %v183_v49, %v2075_v1  ;;  %vm591_vm1 = vcmp.lt.s32.totalorder %v2090_v25, 2  ;;  %v466_v20 = vshll.u32 %v2033_v9, %v2098_v48 }
  0x78   :  { %v2145_v37 = vmul.u32.u64.low %v960_v55, %v959_v28  ;;  %v2146_v59 = vmul.u32.u64.high %v960_v55, %v959_v28, %v2145_v37  ;;  %v467_v6 = vshrl.u32 %v449_v7, %v465_v46  ;;  %v471_v44 = vshll.u32 %v470_v53, 23 }
  0x79   :  { %vm592_vm2 = vcmp.eq.s32.totalorder %v2090_v25, 0  ;;  %vm281_vm3 = vcmp.lt.s32.totalorder %v2081_v42, 2  ;;  %v374_v45 = vxor.u32 2147483648, %v373_v16  ;;  %vm2154_vm5 = vcmp.le.f32.partialorder %v393_v63, 0.7853982 }
  0x7a   :  { %v967_v60 = vmul.u32 %v960_v55, %v951_v26  ;;  %v970_v54 = vadd.s32 1, %v2124_v11  ;;  %v1020_v56 = vshrl.u32 %v1019_v43, 23  ;;  %v185_v9 = vsel %vm178_vm6, %v181_v12, %v184_v36 }
  0x7b   :  { %v597_v48 = vsel %vm595_vm14, %v183_v49, %v2075_v1  ;;  %v2166_v7 = vand.u32 3, %v693_v18  ;;  %v797_v63 = vadd.s32 3, %v2073_v23  ;;  %v286_v8 = vxor.u32 2147483648, %v2117_v14 }
  0x7c   :  { %v479_v55 = vsub.s32 4, %v2009_v41  ;;  %vm969_vm4 = vc.u32 %v2146_v59, %v2123_v15  ;;  %v1579_v24 = vadd.s32 4294967169, %v1020_v56  ;;  %v468_v47 = vor.u32 %v467_v6, %v466_v20 }
  0x7d   :  { %v472_v13 = vor.u32 4788187, %v471_v44  ;;  %v594_v49 = vsel %vm592_vm2, %v2062_v21, %v180_v17  ;;  %v971_v46 = vsel %vm969_vm4, %v970_v54, %v2124_v11  ;;  %v283_v53 = vxor.u32 2147483648, %v1644_v50 }
  0x7e   :  { %v375_v23 = vsel %vm292_vm15, %v374_v45, %v373_v16  ;;  %v972_v10 = vadd.s32 %v971_v46, %v967_v60  ;;  %v1026_v5 = vadd.s32 1, %v1579_v24  ;;  %v2183_v43 = vsel %vm2835_vm10, nan, %v185_v9 }
  0x7f   :  { %vm696_vm6 = vcmp.eq.s32.totalorder %v2166_v7, 0  ;;  %vm699_vm7 = vcmp.eq.s32.totalorder %v2166_v7, 2  ;;  %v2828_v1 = vand.u32 2147483647, %v2046_v19  ;;  %v287_v21 = vsel %vm285_vm11, %v286_v8, %v1644_v50 }
  0x80   :  { %v480_v17 = vsel %vm395_vm13, %v479_v55, %v2009_v41  ;;  %v973_v16 = vadd.s32 536870912, %v972_v10  ;;  %vm1027_vm15 = vcmp.gt.s32.totalorder %v1026_v5, 0  ;;  %v378_v11 = vsel %vm2053_vm0, %v1793_v4, %v375_v23 }
  0x81   :  { %v473_v18 = vand.u32 2147483647, %v472_v13  ;;  %v475_v26 = vcvt.s32.f32 %v468_v47  ;;  %v1028_v28 = vsel %vm1027_vm15, %v1026_v5, 0  ;;  %v284_v12 = vsel %vm282_vm12, %v2117_v14, %v283_v53 }
  0x82   :  { %v2199_v36 = vshrl.u32 %v973_v16, 30  ;;  %v1030_v37 = vand.u32 31, %v1028_v28  ;;  %v1123_v20 = vand.u32 2139095040, %v2049_v57  ;;  %v2204_v41 = vsel %vm2154_vm5, 0, %v480_v17 }
  0x83   :  { %v2208_v34 = vsel %vm591_vm1, %v594_v49, %v597_v48  ;;  %v2213_v4 = vsel %vm696_vm6, %v2117_v14, %v283_v53  ;;  %v2215_v6 = vand.u32 3, %v797_v63  ;;  %1645 = vcosq.f32 %v378_v11 }
  0x84   :  { %v2219_v44 = vsel %vm699_vm7, %v286_v8, %v1644_v50  ;;  %v975_v45 = vshll.u32 %v2199_v36, 30  ;;  %v1031_v60 = vsub.s32 32, %v1030_v37  ;;  %v2224_v25 = vsel %vm281_vm3, %v284_v12, %v287_v21 }
  0x85   :  { %1647 = vsinq.f32 %v378_v11  ;;  %v476_v54 = vmul.f32 %v475_v26, %v473_v18  ;;  %v1023_v14 = vand.u32 8388607, %v2828_v1  ;;  %v1033_v9 = vshll.u32 %v2833_v27, %v1030_v37 }
  0x86   :  { %v2228_v56 = vsub.s32 %v972_v10, %v975_v45  ;;  %v1036_v48 = vshll.u32 %v1768_v29, %v1030_v37  ;;  %v1124_v50 = vshrl.u32 %v1123_v20, 23  ;;  %v1034_v63 = vshrl.u32 %v1768_v29, %v1031_v60 }
  0x87   :  { %v1037_v8 = vshrl.u32 %v1769_v31, %v1031_v60  ;;  %v1039_v42 = vshll.u32 %v1769_v31, %v1030_v37  ;;  %v1040_v55 = vshrl.u32 %v1770_v33, %v1031_v60  ;;  %v1029_v47 = vshrl.u32 %v1028_v28, 5 }
  0x88   :  { %v978_v24 = vsub.s32 0, %v2228_v56  ;;  %v1042_v13 = vshll.u32 %v1770_v33, %v1030_v37  ;;  %v1043_v49 = vshrl.u32 %v2829_v35, %v1031_v60  ;;  %v477_v46 = vxor.u32 2147483648, %v476_v54 }
  0x89   :  { %v2240_v53 = vadd.s32 3, %v2204_v41  ;;  %v1045_v23 = vshll.u32 %v2829_v35, %v1030_v37  ;;  %v2850_v10 = vmov 1326507024   ;;  %v1024_v17 = vor.u32 8388608, %v1023_v14 }
  0x8a   :  { %v1046_v5 = vshrl.u32 %v2850_v10, %v1031_v60  ;;  %v1576_v21 = vmin.u32 %v978_v24, %v2228_v56  ;;  %v2831_v16 = vand.u32 2147483647, %v2049_v57  ;;  %v1583_v11 = vadd.s32 4294967169, %v1124_v50 }
  0x8b   :  { %v1032_v18 = vshrl.u32 %v2833_v27, %v1031_v60  ;;  %v1035_v26 = vor.u32 %v1034_v63, %v1033_v9  ;;  %v1038_v28 = vor.u32 %v1037_v8, %v1036_v48  ;;  %v1041_v12 = vor.u32 %v1040_v55, %v1039_v42 }
  0x8c   :  { %v980_v20 = vclz %v1576_v21  ;;  %v1044_v45 = vor.u32 %v1043_v49, %v1042_v13  ;;  %vm1048_vm0 = vcmp.lt.s32.totalorder %v1029_v47, 1  ;;  %vm1051_vm8 = vcmp.lt.s32.totalorder %v1029_v47, 4 }
  0x8d   :  { %v478_v37 = vsel %vm395_vm13, %v477_v46, %v476_v54  ;;  %v968_v1 = vadd.s32 %v2123_v15, %v2146_v59  ;;  %v1047_v24 = vor.u32 %v1046_v5, %v1045_v23  ;;  %v1053_v14 = vsel %vm1051_vm8, %v1041_v12, 2102212464 }
  0x8e   :  { %v1577_v35 = vadd.s32 4294967294, %v980_v20  ;;  %vm1050_vm9 = vcmp.lt.s32.totalorder %v1029_v47, 3  ;;  %v1064_v50 = vshll.u32 %v1024_v17, 8  ;;  %v2254_v60 = vand.u32 8388607, %v2831_v16 }
  0x8f   :  { %vm1049_vm11 = vcmp.lt.s32.totalorder %v1029_v47, 2  ;;  %v1056_v9 = vsel %vm1048_vm0, %v1035_v26, %v1038_v28  ;;  %v1130_v48 = vadd.s32 1, %v1583_v11  ;;  %v1227_v63 = vand.u32 2139095040, %v2065_v22 }
  0x90   :  { %vm1578_vm12 = vcmp.lt.s32.totalorder %v1577_v35, 0  ;;  %v1052_v54 = vsel %vm1048_vm0, %v1032_v18, %v1035_v26  ;;  %v1054_v15 = vsel %vm1050_vm9, %v1038_v28, %v1053_v14  ;;  %v1057_v59 = vsel %vm1051_vm8, %v1044_v45, 920167782  ;;  %v2261_v8 = vpop.eup %1645 }
  0x91   :  { %v983_v42 = vsel %vm1578_vm12, 0, %v1577_v35  ;;  %v1058_v55 = vsel %vm1050_vm9, %v1041_v12, %v1057_v59  ;;  %v1060_v13 = vsel %vm1048_vm0, %v1038_v28, %v1041_v12  ;;  %v1061_v49 = vsel %vm1051_vm8, %v1047_v24, 1326507024 }
  0x92   :  { %v2266_v46 = vpop.eup %1647  ;;  %v984_v23 = vsub.s32 32, %v983_v42  ;;  %v985_v5 = vshll.u32 %v2228_v56, %v983_v42  ;;  %v988_v21 = vsub.s32 4294967266, %v983_v42  ;;  %v1059_v17 = vsel %vm1049_vm11, %v1056_v9, %v1058_v55 }
  0x93   :  { %v1055_v11 = vsel %vm1049_vm11, %v1052_v54, %v1054_v15  ;;  %v1062_v18 = vsel %vm1050_vm9, %v1044_v45, %v1061_v49  ;;  %v2272_v26 = vmul.u32.u64.low %v1064_v50, %v1059_v17  ;;  %v2273_v35 = vmul.u32.u64.high %v1064_v50, %v1059_v17, %v2272_v26 }
  0x94   :  { %v986_v20 = vshrl.u32 %v968_v1, %v984_v23  ;;  %v989_v28 = vadd.s32 127, %v988_v21  ;;  %v1063_v12 = vsel %vm1049_vm11, %v1060_v13, %v1062_v18  ;;  %vm1131_vm13 = vcmp.gt.s32.totalorder %v1130_v48, 0 }
  0x95   :  { %v389_v24 = vxor.u32 2147483648, %v2261_v8  ;;  %v2278_v14 = vmul.u32.u64.low %v1064_v50, %v1063_v12  ;;  %v2279_v56 = vmul.u32.u64.high %v1064_v50, %v1063_v12, %v2278_v14  ;;  %v1132_v59 = vsel %vm1131_vm13, %v1130_v48, 0 }
  0x96   :  { %v386_v9 = vxor.u32 2147483648, %v2266_v46  ;;  %v987_v54 = vor.u32 %v986_v20, %v985_v5  ;;  %v990_v15 = vshll.u32 %v989_v28, 23  ;;  %v1134_v45 = vand.u32 31, %v1132_v59 }
  0x97   :  { %v481_v42 = vsel %vm2154_vm5, %v1862_v51, %v478_v37  ;;  %v1071_v1 = vmul.u32 %v1064_v50, %v1055_v11  ;;  %v1074_v47 = vadd.s32 1, %v2273_v35  ;;  %v1128_v55 = vor.u32 8388608, %v2254_v60 }
  0x98   :  { %v991_v13 = vor.u32 4788187, %v990_v15  ;;  %v994_v49 = vcvt.s32.f32 %v987_v54  ;;  %v1135_v23 = vsub.s32 32, %v1134_v45  ;;  %v1228_v21 = vshrl.u32 %v1227_v63, 23 }
  0x99   :  { %vm914_vm14 = vcmp.lt.s32.totalorder %v1989_v61, 0  ;;  %vm1073_vm1 = vc.u32 %v2279_v56, %v2272_v26  ;;  %v1133_v48 = vshrl.u32 %v1132_v59, 5  ;;  %v1137_v5 = vshll.u32 %v2833_v27, %v1134_v45 }
  0x9a   :  { %v1140_v52 = vshll.u32 %v1768_v29, %v1134_v45  ;;  %v992_v51 = vand.u32 2147483647, %v991_v13  ;;  %v1075_v37 = vsel %vm1073_vm1, %v1074_v47, %v2273_v35  ;;  %v1138_v50 = vshrl.u32 %v1768_v29, %v1135_v23 }
  0x9b   :  { %v1143_v60 = vshll.u32 %v1769_v31, %v1134_v45  ;;  %v1076_v17 = vadd.s32 %v1075_v37, %v1071_v1  ;;  %v1141_v63 = vshrl.u32 %v1769_v31, %v1135_v23  ;;  %v1144_v11 = vshrl.u32 %v1770_v33, %v1135_v23 }
  0x9c   :  { %v1146_v18 = vshll.u32 %v1770_v33, %v1134_v45  ;;  %v995_v20 = vmul.f32 %v994_v49, %v992_v51  ;;  %v2851_v28 = vmov 920167782   ;;  %v1587_v59 = vadd.s32 4294967169, %v1228_v21 }
  0x9d   :  { %v1147_v12 = vshrl.u32 %v2851_v28, %v1135_v23  ;;  %v1149_v14 = vshll.u32 %v2851_v28, %v1134_v45  ;;  %vm388_vm2 = vcmp.eq.s32.totalorder %v2084_v3, 2  ;;  %v1077_v35 = vadd.s32 536870912, %v1076_v17 }
  0x9e   :  { %v1139_v54 = vor.u32 %v1138_v50, %v1137_v5  ;;  %v1142_v15 = vor.u32 %v1141_v63, %v1140_v52  ;;  %v1150_v47 = vshrl.u32 %v2850_v10, %v1135_v23  ;;  %v2852_v1 = vand.u32 2147483647, %v1989_v61 }
  0x9f   :  { %v1136_v49 = vshrl.u32 %v2833_v27, %v1135_v23  ;;  %v1145_v51 = vor.u32 %v1144_v11, %v1143_v60  ;;  %v1148_v37 = vor.u32 %v1147_v12, %v1146_v18  ;;  %vm1152_vm5 = vcmp.lt.s32.totalorder %v1133_v48, 1 }
  0xa0   :  { %vm2304_vm3 = vcmp.le.f32.partialorder %v2852_v1, 0.7853982  ;;  %vm385_vm4 = vcmp.eq.s32.totalorder %v2084_v3, 0  ;;  %1649 = vcosq.f32 %v481_v42  ;;  %vm803_vm6 = vcmp.eq.s32.totalorder %v2215_v6, 2 }
  0xa1   :  { %v998_v45 = vsub.s32 4, %v2199_v36  ;;  %v2312_v21 = vshrl.u32 %v1077_v35, 30  ;;  %vm1155_vm7 = vcmp.lt.s32.totalorder %v1133_v48, 4  ;;  %vm800_vm15 = vcmp.eq.s32.totalorder %v2215_v6, 0 }
  0xa2   :  { %v996_v5 = vxor.u32 2147483648, %v995_v20  ;;  %v1151_v52 = vor.u32 %v1150_v47, %v1149_v14  ;;  %vm1154_vm0 = vcmp.lt.s32.totalorder %v1133_v48, 3  ;;  %v1157_v23 = vsel %vm1155_vm7, %v1145_v51, 2102212464 }
  0xa3   :  { %v1079_v50 = vshll.u32 %v2312_v21, 30  ;;  %vm1153_vm8 = vcmp.lt.s32.totalorder %v1133_v48, 2  ;;  %v1160_v60 = vsel %vm1152_vm5, %v1139_v54, %v1142_v15  ;;  %v1234_v63 = vadd.s32 1, %v1587_v59 }
  0xa4   :  { %v1156_v11 = vsel %vm1152_vm5, %v1136_v49, %v1139_v54  ;;  %v1158_v18 = vsel %vm1154_vm0, %v1142_v15, %v1157_v23  ;;  %v1161_v12 = vsel %vm1155_vm7, %v1148_v37, 920167782  ;;  %v1168_v35 = vshll.u32 %v1128_v55, 8 }
  0xa5   :  { %1651 = vsinq.f32 %v481_v42  ;;  %v2321_v1 = vsub.s32 %v1076_v17, %v1079_v50  ;;  %v1162_v14 = vsel %vm1154_vm0, %v1145_v51, %v1161_v12  ;;  %v1164_v47 = vsel %vm1152_vm5, %v1142_v15, %v1145_v51 }
  0xa6   :  { %v997_v16 = vsel %vm914_vm14, %v996_v5, %v995_v20  ;;  %v999_v59 = vsel %vm914_vm14, %v998_v45, %v2199_v36  ;;  %v1163_v54 = vsel %vm1153_vm8, %v1160_v60, %v1162_v14  ;;  %v1165_v49 = vsel %vm1155_vm7, %v1151_v52, 1326507024 }
  0xa7   :  { %v1082_v55 = vsub.s32 0, %v2321_v1  ;;  %v1159_v42 = vsel %vm1153_vm8, %v1156_v11, %v1158_v18  ;;  %v1166_v17 = vsel %vm1154_vm0, %v1148_v37, %v1165_v49  ;;  %vm1235_vm9 = vcmp.gt.s32.totalorder %v1234_v63, 0 }
  0xa8   :  { %v1167_v15 = vsel %vm1153_vm8, %v1164_v47, %v1166_v17  ;;  %v2336_v51 = vmul.u32.u64.low %v1168_v35, %v1163_v54  ;;  %v2337_v23 = vmul.u32.u64.high %v1168_v35, %v1163_v54, %v2336_v51  ;;  %v1236_v20 = vsel %vm1235_vm9, %v1234_v63, 0 }
  0xa9   :  { %v1580_v36 = vmin.u32 %v1082_v55, %v2321_v1  ;;  %v2341_v45 = vmul.u32.u64.low %v1168_v35, %v1167_v15  ;;  %v2342_v5 = vmul.u32.u64.high %v1168_v35, %v1167_v15, %v2341_v45  ;;  %v2832_v52 = vand.u32 2147483647, %v2065_v22 }
  0xaa   :  { %v2350_v37 = vsel %vm388_vm2, %v389_v24, %v2266_v46  ;;  %v2353_v48 = vand.u32 3, %v2204_v41  ;;  %v2356_v50 = vand.u32 3, %v2240_v53  ;;  %v1238_v60 = vand.u32 31, %v1236_v20 }
  0xab   :  { %v1000_v63 = vsel %vm2304_vm3, %v1989_v61, %v997_v16  ;;  %v1001_v11 = vsel %vm2304_vm3, 0, %v999_v59  ;;  %v1084_v18 = vclz %v1580_v36  ;;  %v1175_v12 = vmul.u32 %v1168_v35, %v1159_v42 }
  0xac   :  { %v2368_v41 = vsel %vm385_vm4, %v2261_v8, %v386_v9  ;;  %v2375_v53 = vsel %vm803_vm6, %v389_v24, %v2266_v46  ;;  %v1178_v16 = vadd.s32 1, %v2337_v23  ;;  %v1239_v13 = vsub.s32 32, %v1238_v60 }
  0xad   :  { %v2383_v35 = vsel %vm800_vm15, %v2261_v8, %v386_v9  ;;  %v1581_v14 = vadd.s32 4294967294, %v1084_v18  ;;  %vm1177_vm11 = vc.u32 %v2342_v5, %v2336_v51  ;;  %v1231_v47 = vand.u32 8388607, %v2832_v52  ;;  %v2389_v59 = vpop.eup %1649 }
  0xae   :  { %1653 = vcosq.f32 %v1000_v63  ;;  %v1005_v24 = vadd.s32 3, %v1001_v11  ;;  %v1072_v54 = vadd.s32 %v2272_v26, %v2279_v56  ;;  %v1179_v46 = vsel %vm1177_vm11, %v1178_v16, %v2337_v23 }
  0xaf   :  { %1655 = vsinq.f32 %v1000_v63  ;;  %vm1582_vm12 = vcmp.lt.s32.totalorder %v1581_v14, 0  ;;  %v1180_v8 = vadd.s32 %v1179_v46, %v1175_v12  ;;  %v1241_v9 = vshll.u32 %v2833_v27, %v1238_v60 }
  0xb0   :  { %v1087_v49 = vsel %vm1582_vm12, 0, %v1581_v14  ;;  %v1242_v55 = vshrl.u32 %v1768_v29, %v1239_v13  ;;  %v1244_v42 = vshll.u32 %v1768_v29, %v1238_v60  ;;  %v1247_v17 = vshll.u32 %v1769_v31, %v1238_v60 }
  0xb1   :  { %v1088_v15 = vsub.s32 32, %v1087_v49  ;;  %v1089_v36 = vshll.u32 %v2321_v1, %v1087_v49  ;;  %v1092_v45 = vsub.s32 4294967266, %v1087_v49  ;;  %v1181_v11 = vadd.s32 536870912, %v1180_v8 }
  0xb2   :  { %v2399_v26 = vpop.eup %1651  ;;  %v1245_v56 = vshrl.u32 %v1769_v31, %v1239_v13  ;;  %v1248_v23 = vshrl.u32 %v1770_v33, %v1239_v13  ;;  %v1250_v63 = vshll.u32 %v1770_v33, %v1238_v60  ;;  %v1251_v18 = vshrl.u32 %v2851_v28, %v1239_v13 }
  0xb3   :  { %v1090_v12 = vshrl.u32 %v1072_v54, %v1088_v15  ;;  %v1093_v16 = vadd.s32 127, %v1092_v45  ;;  %v2405_v29 = vshrl.u32 %v1181_v11, 30  ;;  %v2407_v14 = vshrl.u32 %v1236_v20, 5 }
  0xb4   :  { %v2409_v46 = vand.u32 3, %v1005_v24  ;;  %vm1018_vm13 = vcmp.lt.s32.totalorder %v2046_v19, 0  ;;  %v1232_v1 = vor.u32 8388608, %v1231_v47  ;;  %v1253_v49 = vshll.u32 %v2851_v28, %v1238_v60 }
  0xb5   :  { %v1254_v31 = vshrl.u32 %v2850_v10, %v1239_v13  ;;  %v492_v52 = vxor.u32 2147483648, %v2389_v59  ;;  %v1091_v33 = vor.u32 %v1090_v12, %v1089_v36  ;;  %v1094_v27 = vshll.u32 %v1093_v16, 23 }
  0xb6   :  { %v1183_v54 = vshll.u32 %v2405_v29, 30  ;;  %v2855_v15 = vand.u32 2147483647, %v2046_v19  ;;  %v1243_v24 = vor.u32 %v1242_v55, %v1241_v9  ;;  %v1246_v45 = vor.u32 %v1245_v56, %v1244_v42 }
  0xb7   :  { %v1249_v11 = vor.u32 %v1248_v23, %v1247_v17  ;;  %v1252_v47 = vor.u32 %v1251_v18, %v1250_v63  ;;  %v1095_v58 = vor.u32 4788187, %v1094_v27  ;;  %v1098_v28 = vcvt.s32.f32 %v1091_v33 }
  0xb8   :  { %vm2418_vm14 = vcmp.le.f32.partialorder %v2855_v15, 0.7853982  ;;  %v2422_v60 = vsub.s32 %v1180_v8, %v1183_v54  ;;  %vm1256_vm1 = vcmp.lt.s32.totalorder %v2407_v14, 1  ;;  %v2858_v10 = vmov 683565275  }
  0xb9   :  { %v1240_v36 = vshrl.u32 %v2858_v10, %v1239_v13  ;;  %v1255_v12 = vor.u32 %v1254_v31, %v1253_v49  ;;  %vm1258_vm2 = vcmp.lt.s32.totalorder %v2407_v14, 3  ;;  %vm1259_vm3 = vcmp.lt.s32.totalorder %v2407_v14, 4 }
  0xba   :  { %v489_v16 = vxor.u32 2147483648, %v2399_v26  ;;  %v1096_v15 = vand.u32 2147483647, %v1095_v58  ;;  %v1186_v9 = vsub.s32 0, %v2422_v60  ;;  %v1261_v27 = vsel %vm1259_vm3, %v1249_v11, 2102212464 }
  0xbb   :  { %vm1257_vm5 = vcmp.lt.s32.totalorder %v2407_v14, 2  ;;  %v1264_v8 = vsel %vm1256_vm1, %v1243_v24, %v1246_v45  ;;  %v1265_v13 = vsel %vm1259_vm3, %v1252_v47, 920167782  ;;  %v2437_v55 = vshll.u32 %v1232_v1, 8  ;;  %v1654_v42 = vpop.eup %1653 }
  0xbc   :  { %vm491_vm4 = vcmp.eq.s32.totalorder %v2353_v48, 2  ;;  %v1099_v17 = vmul.f32 %v1098_v28, %v1096_v15  ;;  %v1584_v58 = vmin.u32 %v1186_v9, %v2422_v60  ;;  %v1266_v56 = vsel %vm1258_vm2, %v1249_v11, %v1265_v13  ;;  %v1656_v63 = vpop.eup %1655  ;;  %v1717_v13 = vld [vmem:[#allocation2 + $0x128] sm:$0xff] }
  0xbd   :  { %v1268_v23 = vsel %vm1256_vm1, %v1246_v45, %v1249_v11  ;;  %vm1007_vm6 = vcmp.lt.s32.totalorder %v2409_v46, 2  ;;  %v1260_v18 = vsel %vm1256_vm1, %v1240_v36, %v1243_v24  ;;  %v1262_v1 = vsel %vm1258_vm2, %v1246_v45, %v1261_v27 }
  0xbe   :  { %v1269_v49 = vsel %vm1259_vm3, %v1255_v12, 1326507024  ;;  %vm488_vm7 = vcmp.eq.s32.totalorder %v2353_v48, 0  ;;  %vm904_vm15 = vcmp.eq.s32.totalorder %v2356_v50, 0  ;;  %vm907_vm0 = vcmp.eq.s32.totalorder %v2356_v50, 2 }
  0xbf   :  { %v1100_v31 = vxor.u32 2147483648, %v1099_v17  ;;  %vm1122_vm8 = vcmp.lt.s32.totalorder %v2049_v57, 0  ;;  %v1188_v33 = vclz %v1584_v58  ;;  %v1267_v54 = vsel %vm1257_vm5, %v1264_v8, %v1266_v56 }
  0xc0   :  { %v1270_v24 = vsel %vm1258_vm2, %v1252_v47, %v1269_v49  ;;  %vm1011_vm9 = vcmp.eq.s32.totalorder %v2409_v46, 2  ;;  %v1012_v45 = vxor.u32 2147483648, %v1654_v42  ;;  %v1102_v11 = vsub.s32 4, %v2312_v21  ;;  %v1719_v49 = vld [vmem:[#allocation2 + $0x138] sm:$0xff] }
  0xc1   :  { %v1271_v28 = vsel %vm1257_vm5, %v1268_v23, %v1270_v24  ;;  %vm384_vm11 = vcmp.lt.s32.totalorder %v2084_v3, 2  ;;  %v1101_v10 = vsel %vm1018_vm13, %v1100_v31, %v1099_v17  ;;  %v1585_v36 = vadd.s32 4294967294, %v1188_v33 }
  0xc2   :  { %v2470_v47 = vmul.u32.u64.low %v2437_v55, %v1271_v28  ;;  %v2471_v12 = vmul.u32.u64.high %v2437_v55, %v1271_v28, %v2470_v47  ;;  %vm487_vm2 = vcmp.lt.s32.totalorder %v2353_v48, 2  ;;  %v1009_v15 = vxor.u32 2147483648, %v1656_v63  ;;  %v2573_v48 = vld [vmem:[#allocation2 + $0xf0] sm:$0xff] }
  0xc3   :  { %v1263_v9 = vsel %vm1257_vm5, %v1260_v18, %v1262_v1  ;;  %v2478_v27 = vmul.u32.u64.low %v2437_v55, %v1267_v54  ;;  %v2479_v8 = vmul.u32.u64.high %v2437_v55, %v1267_v54, %v2478_v27  ;;  %vm279_vm1 = vweird.f32 %v1717_v13  ;;  %v1718_v1 = vld [vmem:[#allocation2 + $0x130] sm:$0xff] }
  0xc4   :  { %vm1008_vm10 = vcmp.eq.s32.totalorder %v2409_v46, 0  ;;  %v1104_v17 = vsel %vm2418_vm14, %v2046_v19, %v1101_v10  ;;  %v1176_v58 = vadd.s32 %v2336_v51, %v2342_v5  ;;  %vm1586_vm3 = vcmp.lt.s32.totalorder %v1585_v36, 0 }
  0xc5   :  { %v1013_v14 = vsel %vm1011_vm9, %v1012_v45, %v1656_v63  ;;  %v1103_v56 = vsel %vm1018_vm13, %v1102_v11, %v2312_v21  ;;  %v1191_v23 = vsel %vm1586_vm3, 0, %v1585_v36  ;;  %v1206_v18 = vsub.s32 4, %v2405_v29 }
  0xc6   :  { %vm382_vm5 = vweird.f32 %v1718_v1  ;;  %vm485_vm12 = vweird.f32 %v1719_v49  ;;  %v1192_v31 = vsub.s32 32, %v1191_v23  ;;  %v1193_v33 = vshll.u32 %v2422_v60, %v1191_v23 }
  0xc7   :  { %v1196_v54 = vsub.s32 4294967266, %v1191_v23  ;;  %v1279_v51 = vmul.u32 %v2437_v55, %v1263_v9  ;;  %v1010_v5 = vsel %vm1008_vm10, %v1654_v42, %v1009_v15  ;;  %1657 = vcosq.f32 %v1104_v17 }
  0xc8   :  { %vm1281_vm13 = vc.u32 %v2471_v12, %v2478_v27  ;;  %v1282_v21 = vadd.s32 1, %v2479_v8  ;;  %v1105_v63 = vsel %vm2418_vm14, 0, %v1103_v56  ;;  %1659 = vsinq.f32 %v1104_v17 }
  0xc9   :  { %v1194_v24 = vshrl.u32 %v1176_v58, %v1192_v31  ;;  %v1197_v45 = vadd.s32 127, %v1196_v54  ;;  %v493_v60 = vsel %vm491_vm4, %v492_v52, %v2399_v26  ;;  %v2859_v55 = vand.u32 2147483647, %v2049_v57  ;;  %v2596_v54 = vld [vmem:[#allocation2 + $0x108] sm:$0xff] }
  0xca   :  { %v1207_v20 = vsel %vm1122_vm8, %v1206_v18, %v2405_v29  ;;  %v1283_v11 = vsel %vm1281_vm13, %v1282_v21, %v2479_v8  ;;  %v1014_v28 = vsel %vm1007_vm6, %v1010_v5, %v1013_v14  ;;  %v490_v15 = vsel %vm488_vm7, %v2389_v59, %v489_v16  ;;  %v2581_v18 = vld [vmem:[#allocation2 + $0x100] sm:$0xff] }
  0xcb   :  { %vm2511_vm10 = vcmp.le.f32.partialorder %v2859_v55, 0.7853982  ;;  %v1195_v10 = vor.u32 %v1194_v24, %v1193_v33  ;;  %v1198_v36 = vshll.u32 %v1197_v45, 23  ;;  %v1284_v47 = vadd.s32 %v1283_v11, %v1279_v51  ;;  %v2594_v33 = vld [vmem:[#allocation2 + $0xf8] sm:$0xff] }
  0xcc   :  { %v906_v29 = vsel %vm904_vm15, %v2389_v59, %v489_v16  ;;  %v909_v46 = vsel %vm907_vm0, %v492_v52, %v2399_v26  ;;  %v1109_v9 = vadd.s32 3, %v1105_v63  ;;  %v1209_v58 = vsel %vm2511_vm10, 0, %v1207_v20  ;;  %v2553_v26 = vld [vmem:[#allocation2 + $0xe0] sm:$0xff]  ;;  %v2606_v63 = vld [vmem:[#allocation2 + $0x110] sm:$0xff] }
  0xcd   :  { %v1199_v8 = vor.u32 4788187, %v1198_v36  ;;  %v1202_v17 = vcvt.s32.f32 %v1195_v10  ;;  %v1285_v14 = vadd.s32 536870912, %v1284_v47  ;;  %v391_v56 = vsel %vm384_vm11, %v2368_v41, %v2350_v37  ;;  %v2563_v37 = vld [vmem:[#allocation2 + $0xe8] sm:$0xff] }
  0xce   :  { %vm2862_vm14 = vweird.f32 %v1787_v0  ;;  %vm2863_vm4 = vcmp.lt.s32.totalorder %v2166_v7, 2  ;;  %vm2864_vm6 = vweird.f32 %v1989_v61  ;;  %v494_v23 = vsel %vm487_vm2, %v490_v15, %v493_v60  ;;  %v2614_v60 = vld [vmem:[#allocation2 + $0x118] sm:$0xff] }
  0xcf   :  { %v2545_v16 = vsel %vm2862_vm14, nan, %v2208_v34  ;;  %v702_v52 = vsel %vm2863_vm4, %v2213_v4, %v2219_v44  ;;  %v1015_v59 = vsel %vm2864_vm6, nan, %v1014_v28  ;;  %vm2865_vm7 = vcmp.lt.s32.totalorder %v2215_v6, 2 }
  0xd0   :  { %v806_v0 = vsel %vm2865_vm7, %v2383_v35, %v2375_v53  ;;  %v1200_v3 = vand.u32 2147483647, %v1199_v8  ;;  %v2561_v34 = vshrl.u32 %v1285_v14, 30  ;;  %v2567_v7 = vsel %vm279_vm1, nan, %v2224_v25 }
  0xd1   :  { %vm2866_vm15 = vcmp.lt.s32.totalorder %v2356_v50, 2  ;;  %v2571_v4 = vand.u32 3, %v1109_v9  ;;  %v1213_v44 = vadd.s32 3, %v1209_v58  ;;  %v2576_v6 = vsel %vm279_vm1, nan, %v702_v52  ;;  %v2636_v9 = vld [vmem:[#allocation2 + $0x40] sm:$0xff]  ;;  %v2653_v52 = vld [vmem:[#allocation2 + $0x48] sm:$0xff] }
  0xd2   :  { %v910_v61 = vsel %vm2866_vm15, %v906_v29, %v909_v46  ;;  %v1203_v41 = vmul.f32 %v1202_v17, %v1200_v3  ;;  %v1287_v53 = vshll.u32 %v2561_v34, 30  ;;  %v2579_v35 = vmul.f32 %v1015_v59, %v1015_v59  ;;  %v2659_v3 = vld [vmem:[#allocation2 + $0x68] sm:$0xff] }
  0xd3   :  { %v2584_v25 = vsel %vm382_vm5, nan, %v391_v56  ;;  %v2587_v50 = vsel %vm485_vm12, nan, %v494_v23  ;;  %v2590_v31 = vsel %vm382_vm5, nan, %v806_v0  ;;  %v1336_v13 = vmul.f32 %v2553_v26, %v2553_v26  ;;  %2872 = vst [vmem:[#allocation11_spill] sm:$0xff] %v2659_v3 }
  0xd4   :  { %2867 = vst [vmem:[#allocation9_spill] sm:$0xff] %v2579_v35  ;;  %v2599_v51 = vsel %vm485_vm12, nan, %v910_v61  ;;  %v1204_v5 = vxor.u32 2147483648, %v1203_v41  ;;  %vm1226_vm0 = vcmp.lt.s32.totalorder %v2065_v22, 0  ;;  %v2602_v21 = vsub.s32 %v1284_v47, %v1287_v53  ;;  %v1658_v45 = vpop.eup %1657 }
  0xd5   :  { %v1337_v1 = vmul.f32 %v2563_v37, %v2563_v37  ;;  %vm1112_vm9 = vcmp.eq.s32.totalorder %v2571_v4, 0  ;;  %vm1115_vm11 = vcmp.eq.s32.totalorder %v2571_v4, 2  ;;  %v2610_v24 = vand.u32 3, %v1213_v44  ;;  %v1660_v10 = vpop.eup %1659 }
  0xd6   :  { %v1338_v49 = vmul.f32 %v2573_v48, %v2573_v48  ;;  %vm1111_vm12 = vcmp.lt.s32.totalorder %v2571_v4, 2  ;;  %v1205_v55 = vsel %vm1122_vm8, %v1204_v5, %v1203_v41  ;;  %v1290_v20 = vsub.s32 0, %v2602_v21 }
  0xd7   :  { %v1340_v28 = vmul.f32 %v2581_v18, %v2581_v18  ;;  %v1208_v36 = vsel %vm2511_vm10, %v2049_v57, %v1205_v55  ;;  %v2868_v47 = vand.u32 2147483647, %v2065_v22  ;;  %v1339_v29 = vmul.f32 %v2594_v33, %v2594_v33 }
  0xd8   :  { %v1341_v46 = vmul.f32 %v2596_v54, %v2596_v54  ;;  %1661 = vrcp.f32 %v1336_v13  ;;  %v1280_v42 = vadd.s32 %v2478_v27, %v2471_v12  ;;  %v1588_v8 = vmin.u32 %v1290_v20, %v2602_v21  ;;  %v2655_v12 = vld [vmem:[#allocation2 + $0x50] sm:$0xff]  ;;  %v2657_v27 = vld [vmem:[#allocation2 + $0x60] sm:$0xff] }
  0xd9   :  { %vm2628_vm1 = vcmp.le.f32.partialorder %v2868_v47, 0.7853982  ;;  %1663 = vcosq.f32 %v1208_v36  ;;  %v1342_v17 = vmul.f32 %v2606_v63, %v2606_v63  ;;  %vm1108_vm8 = vweird.f32 %v2046_v19  ;;  %2871 = vst [vmem:[#allocation10_spill] sm:$0xff] %v2655_v12 }
  0xda   :  { %1665 = vsinq.f32 %v1208_v36  ;;  %v1310_v58 = vsub.s32 4, %v2561_v34  ;;  %v2647_v14 = vmul.f32 %v2614_v60, %v2614_v60  ;;  %v2651_v56 = vmul.f32 %v2636_v9, %v2636_v9 }
  0xdb   :  { %v1113_v59 = vxor.u32 2147483648, %v1660_v10  ;;  %v1116_v23 = vxor.u32 2147483648, %v1658_v45  ;;  %v1292_v0 = vclz %v1588_v8  ;;  %1667 = vrcp.f32 %v1340_v28 }
  0xdc   :  { %v2663_v61 = vmul.f32 %v2653_v52, %v2653_v52  ;;  %v2667_v44 = vmul.f32 %v2655_v12, %v2655_v12  ;;  %v2671_v41 = vmul.f32 %v2657_v27, %v2657_v27  ;;  %1669 = vrcp.f32 %v1337_v1 }
  0xdd   :  { %v1589_v53 = vadd.s32 4294967294, %v1292_v0  ;;  %v2675_v13 = vmul.f32 %v2659_v3, %v2659_v3  ;;  %1671 = vrcp.f32 %v1338_v49  ;;  %v1368_v5 = vmul.f32 %v2183_v43, %v2001_v30 }
  0xde   :  { %vm1219_vm2 = vcmp.eq.s32.totalorder %v2610_v24, 2  ;;  %v1311_v55 = vsel %vm1226_vm0, %v1310_v58, %v2561_v34  ;;  %1673 = vrcp.f32 %v1341_v46  ;;  %v1369_v20 = vmul.f32 %v2567_v7, %v2003_v38 }
  0xdf   :  { %v1372_v1 = vmul.f32 %v2545_v16, %v2019_v40  ;;  %v1114_v28 = vsel %vm1112_vm9, %v1658_v45, %v1113_v59  ;;  %v1117_v49 = vsel %vm1115_vm11, %v1116_v23, %v1660_v10  ;;  %vm1216_vm3 = vcmp.eq.s32.totalorder %v2610_v24, 0  ;;  %v2699_v45 = vld [vmem:[#allocation2 + $0x70] sm:$0xff] }
  0xe0   :  { %vm1590_vm5 = vcmp.lt.s32.totalorder %v1589_v53, 0  ;;  %1675 = vrcp.f32 %v1342_v17  ;;  %vm1215_vm13 = vcmp.lt.s32.totalorder %v2610_v24, 2  ;;  %v1370_v36 = vmul.f32 %v2584_v25, %v2005_v32  ;;  %2873 = vst [vmem:[#allocation12_spill] sm:$0xff] %v2699_v45 }
  0xe1   :  { %v1295_v34 = vsel %vm1590_vm5, 0, %v1589_v53  ;;  %v1373_v47 = vmul.f32 %v2576_v6, %v2021_v62  ;;  %v1374_v46 = vmul.f32 %v2590_v31, %v2023_v2  ;;  %v1313_v17 = vsel %vm2628_vm1, 0, %v1311_v55 }
  0xe2   :  { %v1296_v8 = vsub.s32 32, %v1295_v34  ;;  %v1297_v10 = vshll.u32 %v2602_v21, %v1295_v34  ;;  %v1300_v58 = vsub.s32 4294967266, %v1295_v34  ;;  %v1118_v59 = vsel %vm1111_vm12, %v1114_v28, %v1117_v49  ;;  %v2874_v21 = vld [vmem:[#allocation8_spill] sm:$0xff] }
  0xe3   :  { %vm1212_vm10 = vweird.f32 %v2049_v57  ;;  %v2709_v23 = vmul.f32 %v2699_v45, %v2699_v45  ;;  %1677 = vrcp.f32 %v1339_v29  ;;  %v1371_v0 = vmul.f32 %v2587_v50, %v2007_v39 }
  0xe4   :  { %v1298_v53 = vshrl.u32 %v1280_v42, %v1296_v8  ;;  %v1301_v11 = vadd.s32 127, %v1300_v58  ;;  %v1375_v34 = vmul.f32 %v2599_v51, %v2874_v21  ;;  %v1376_v35 = vadd.f32 %v1372_v1, %v1368_v5 }
  0xe5   :  { %v1317_v55 = vadd.s32 3, %v1313_v17  ;;  %v1377_v12 = vadd.f32 %v1373_v47, %v1369_v20  ;;  %v1378_v4 = vadd.f32 %v1374_v46, %v1370_v36  ;;  %v1380_v28 = vmul.f32 %v2183_v43, %v2019_v40  ;;  %v2717_v49 = vpop.eup %1661 }
  0xe6   :  { %v1119_v29 = vsel %vm1108_vm8, nan, %v1118_v59  ;;  %v1299_v45 = vor.u32 %v1298_v53, %v1297_v10  ;;  %v1302_v3 = vshll.u32 %v1301_v11, 23  ;;  %v1384_v42 = vmul.f32 %v2545_v16, %v2001_v30  ;;  %v1664_v8 = vpop.eup %1663 }
  0xe7   :  { %v1381_v5 = vmul.f32 %v2567_v7, %v2021_v62  ;;  %v1382_v20 = vmul.f32 %v2584_v25, %v2023_v2  ;;  %v1385_v40 = vmul.f32 %v2576_v6, %v2003_v38  ;;  %v1386_v43 = vmul.f32 %v2590_v31, %v2005_v32  ;;  %v1666_v19 = vpop.eup %1665 }
  0xe8   :  { %v1220_v1 = vxor.u32 2147483648, %v1664_v8  ;;  %v1303_v36 = vor.u32 4788187, %v1302_v3  ;;  %v1306_v11 = vcvt.s32.f32 %v1299_v45  ;;  %v2731_v47 = vadd.f32 %v1375_v34, %v1371_v0  ;;  %v2733_v30 = vpop.eup %1667 }
  0xe9   :  { %v1217_v16 = vxor.u32 2147483648, %v1666_v19  ;;  %v2735_v46 = vmul.f32 %v1119_v29, %v1119_v29  ;;  %v1383_v62 = vmul.f32 %v2587_v50, %v2874_v21  ;;  %v1387_v38 = vmul.f32 %v2599_v51, %v2007_v39  ;;  %v2741_v2 = vpop.eup %1669 }
  0xea   :  { %v1221_v32 = vsel %vm1219_vm2, %v1220_v1, %v1666_v19  ;;  %v1304_v7 = vand.u32 2147483647, %v1303_v36  ;;  %1679 = vrcp.f32 %v2647_v14  ;;  %v1388_v6 = vsub.f32 %v1380_v28, %v1384_v42  ;;  %v1672_v25 = vpop.eup %1671 }
  0xeb   :  { %v1218_v31 = vsel %vm1216_vm3, %v1664_v8, %v1217_v16  ;;  %v2748_v3 = vand.u32 3, %v1317_v55  ;;  %v1389_v45 = vsub.f32 %v1381_v5, %v1385_v40  ;;  %v1390_v50 = vsub.f32 %v1382_v20, %v1386_v43  ;;  %v1674_v10 = vpop.eup %1673 }
  0xec   :  { %v1222_v39 = vsel %vm1215_vm13, %v1218_v31, %v1221_v32  ;;  %v1307_v51 = vmul.f32 %v1306_v11, %v1304_v7  ;;  %v1416_v58 = vmul.f32 %v2717_v49, %v2671_v41  ;;  %v1420_v14 = vmul.f32 %v2733_v30, %v2651_v56  ;;  %v2876_v7 = vld [vmem:[#allocation10_spill] sm:$0xff] }
  0xed   :  { %v1676_v17 = vpop.eup %1675  ;;  %v1333_v59 = vsub.f32 1.0, %v2735_v46  ;;  %v2757_v0 = vsub.f32 %v1383_v62, %v1387_v38  ;;  %v1392_v53 = vmul.f32 %v1376_v35, %v1376_v35  ;;  %v1393_v21 = vmul.f32 %v1377_v12, %v1377_v12  ;;  %v36_v38 = vld [vmem:[#allocation2 + $0x58] sm:$0xff] }
  0xee   :  { %v1223_v34 = vsel %vm1212_vm10, nan, %v1222_v39  ;;  %v1308_v55 = vxor.u32 2147483648, %v1307_v51  ;;  %v1394_v24 = vmul.f32 %v1378_v4, %v1378_v4  ;;  %v1400_v28 = vmul.f32 %v1388_v6, %v1388_v6  ;;  %v2877_v6 = vld [vmem:[#allocation12_spill] sm:$0xff] }
  0xef   :  { %v1401_v29 = vmul.f32 %v1389_v45, %v1389_v45  ;;  %v1402_v42 = vmul.f32 %v1390_v50, %v1390_v50  ;;  %v1417_v8 = vmul.f32 %v2741_v2, %v2675_v13  ;;  %v1418_v5 = vmul.f32 %v1672_v25, %v2709_v23 }
  0xf0   :  { %v2764_v20 = vpop.eup %1677  ;;  %v1309_v40 = vsel %vm1226_vm0, %v1308_v55, %v1307_v51  ;;  %v1421_v35 = vmul.f32 %v1674_v10, %v2663_v61  ;;  %v1422_v57 = vmul.f32 %v1676_v17, %v2667_v44  ;;  %v1424_v12 = vadd.f32 %v1420_v14, %v1416_v58 }
  0xf1   :  { %v1312_v4 = vsel %vm2628_vm1, %v2065_v22, %v1309_v40  ;;  %v1330_v43 = vmul.f32 %v1223_v34, %v1223_v34  ;;  %v1432_v19 = vmul.f32 %v2733_v30, %v2671_v41  ;;  %v1433_v1 = vmul.f32 %v1674_v10, %v2675_v13  ;;  %v41_v13 = vld [vmem:[#allocation2 + $0x78] sm:$0xff] }
  0xf2   :  { %1681 = vcosq.f32 %v1312_v4  ;;  %v1436_v36 = vmul.f32 %v2717_v49, %v2651_v56  ;;  %v1456_v11 = vmul.f32 %v2581_v18, %v2553_v26  ;;  %v1457_v16 = vmul.f32 %v2596_v54, %v2563_v37 }
  0xf3   :  { %1683 = vsinq.f32 %v1312_v4  ;;  %v1434_v15 = vmul.f32 %v1676_v17, %v2709_v23  ;;  %v1437_v62 = vmul.f32 %v2741_v2, %v2663_v61  ;;  %v1438_v41 = vmul.f32 %v1672_v25, %v2667_v44  ;;  %v2875_v61 = vld [vmem:[#allocation11_spill] sm:$0xff] }
  0xf4   :  { %v1458_v32 = vmul.f32 %v2606_v63, %v2573_v48  ;;  %v1459_v56 = vmul.f32 %v2614_v60, %v2594_v33  ;;  %1685 = vlog2.f32 %v1456_v11  ;;  %v1468_v26 = vmul.f32 %v2657_v27, %v2636_v9 }
  0xf5   :  { %v1334_v37 = vsub.f32 1.0, %v1330_v43  ;;  %v1425_v18 = vadd.f32 %v1421_v35, %v1417_v8  ;;  %v1426_v54 = vadd.f32 %v1422_v57, %v1418_v5  ;;  %1687 = vlog2.f32 %v1457_v16 }
  0xf6   :  { %v1440_v23 = vadd.f32 %v1436_v36, %v1432_v19  ;;  %1689 = vlog2.f32 %v1458_v32  ;;  %v1469_v44 = vmul.f32 %v2875_v61, %v2653_v52  ;;  %v1470_v31 = vmul.f32 %v2877_v6, %v2876_v7  ;;  %v2878_v52 = vld [vmem:[#allocation9_spill] sm:$0xff] }
  0xf7   :  { %v1680_v48 = vpop.eup %1679  ;;  %v1441_v63 = vadd.f32 %v1437_v62, %v1433_v1  ;;  %v1442_v45 = vadd.f32 %v1438_v41, %v1434_v15  ;;  %1691 = vlog2.f32 %v1459_v56  ;;  %v1471_v33 = vmul.f32 %v41_v13, %v36_v38 }
  0xf8   :  { %v1396_v60 = vmul.f32 %v2717_v49, %v1392_v53  ;;  %v1397_v9 = vmul.f32 %v2741_v2, %v1393_v21  ;;  %v1398_v27 = vmul.f32 %v1672_v25, %v1394_v24  ;;  %1693 = vlog2.f32 %v1468_v26 }
  0xf9   :  { %v1404_v50 = vmul.f32 %v2733_v30, %v1400_v28  ;;  %v1405_v39 = vmul.f32 %v1674_v10, %v1401_v29  ;;  %v1406_v51 = vmul.f32 %v1676_v17, %v1402_v42  ;;  %1695 = vlog2.f32 %v1469_v44 }
  0xfa   :  { %v1428_v58 = vmul.f32 %v1424_v12, %v2878_v52  ;;  %v1429_v14 = vmul.f32 %v1425_v18, %v2735_v46  ;;  %v2879_v34 = vsub.f32 1.0, %v2878_v52  ;;  %1697 = vlog2.f32 %v1470_v31 }
  0xfb   :  { %v1430_v8 = vmul.f32 %v1426_v54, %v1330_v43  ;;  %v1445_v5 = vmul.f32 %v1441_v63, %v1333_v59  ;;  %v1446_v49 = vmul.f32 %v1442_v45, %v1334_v37  ;;  %1699 = vlog2.f32 %v1471_v33 }
  0xfc   :  { %v1444_v55 = vmul.f32 %v1440_v23, %v2879_v34  ;;  %v1347_v2 = vmul.f32 %v36_v38, %v36_v38  ;;  %v1351_v25 = vmul.f32 %v41_v13, %v41_v13  ;;  %v1395_v30 = vmul.f32 %v2731_v47, %v2731_v47 }
  0xfd   :  { %vm1316_vm14 = vweird.f32 %v2065_v22  ;;  %vm1319_vm4 = vcmp.lt.s32.totalorder %v2748_v3, 2  ;;  %v1403_v46 = vmul.f32 %v2757_v0, %v2757_v0  ;;  %vm1320_vm6 = vcmp.eq.s32.totalorder %v2748_v3, 0 }
  0xfe   :  { %v1408_v10 = vadd.f32 %v1404_v50, %v1396_v60  ;;  %v1409_v17 = vadd.f32 %v1405_v39, %v1397_v9  ;;  %v1448_v53 = vadd.f32 %v1444_v55, %v1428_v58  ;;  %vm1323_vm7 = vcmp.eq.s32.totalorder %v2748_v3, 2 }
  0xff   :  { %v1682_v59 = vpop.eup %1681  ;;  %v1410_v21 = vadd.f32 %v1406_v51, %v1398_v27  ;;  %v1449_v24 = vadd.f32 %v1445_v5, %v1429_v14  ;;  %v1450_v28 = vadd.f32 %v1446_v49, %v1430_v8  ;;  %v1399_v42 = vmul.f32 %v2764_v20, %v1395_v30 }
 0x100   :  { %v1684_v29 = vpop.eup %1683  ;;  %v1324_v47 = vxor.u32 2147483648, %v1682_v59  ;;  %v1419_v40 = vmul.f32 %v2764_v20, %v1351_v25  ;;  %v1423_v35 = vmul.f32 %v1680_v48, %v1347_v2  ;;  %v1407_v12 = vmul.f32 %v1680_v48, %v1403_v46 }
 0x101   :  { %v1686_v57 = vpop.eup %1685  ;;  %v1321_v0 = vxor.u32 2147483648, %v1684_v29  ;;  %v1435_v4 = vmul.f32 %v1680_v48, %v1351_v25  ;;  %v1439_v43 = vmul.f32 %v2764_v20, %v1347_v2  ;;  %v1412_v36 = vmul.f32 2.0, %v1408_v10 }
 0x102   :  { %v1688_v19 = vpop.eup %1687  ;;  %v1325_v1 = vsel %vm1323_vm7, %v1324_v47, %v1684_v29  ;;  %v1413_v11 = vmul.f32 2.0, %v1409_v17  ;;  %v1452_v16 = vmul.f32 0.5, %v1448_v53  ;;  %v1414_v41 = vmul.f32 2.0, %v1410_v21 }
 0x103   :  { %v1690_v15 = vpop.eup %1689  ;;  %v1322_v62 = vsel %vm1320_vm6, %v1682_v59, %v1321_v0  ;;  %v1453_v38 = vmul.f32 0.5, %v1449_v24  ;;  %v1454_v13 = vmul.f32 0.5, %v1450_v28  ;;  %v1427_v26 = vadd.f32 %v1423_v35, %v1419_v40 }
 0x104   :  { %v1692_v32 = vpop.eup %1691  ;;  %v1326_v56 = vsel %vm1319_vm4, %v1322_v62, %v1325_v1  ;;  %v1461_v37 = vmul.f32 0.6931472, %v1686_v57  ;;  %v1443_v54 = vadd.f32 %v1439_v43, %v1435_v4  ;;  %v1463_v23 = vmul.f32 0.6931472, %v1688_v19 }
 0x105   :  { %v1694_v18 = vpop.eup %1693  ;;  %v1327_v20 = vsel %vm1316_vm14, nan, %v1326_v56  ;;  %v1465_v7 = vmul.f32 0.6931472, %v1690_v15  ;;  %v1484_v31 = vadd.f32 %v1452_v16, %v1412_v36  ;;  %v1411_v63 = vadd.f32 %v1407_v12, %v1399_v42 }
 0x106   :  { %v1696_v61 = vpop.eup %1695  ;;  %v1331_v44 = vmul.f32 %v1327_v20, %v1327_v20  ;;  %v1473_v6 = vmul.f32 0.6931472, %v1694_v18  ;;  %v1485_v33 = vadd.f32 %v1453_v38, %v1413_v11  ;;  %v1486_v60 = vadd.f32 %v1454_v13, %v1414_v41 }
 0x107   :  { %v1698_v48 = vpop.eup %1697  ;;  %v1475_v45 = vmul.f32 0.6931472, %v1696_v61  ;;  %v1467_v51 = vmul.f32 0.6931472, %v1692_v32  ;;  %v1415_v8 = vmul.f32 2.0, %v1411_v63 }
 0x108   :  { %v1700_v3 = vpop.eup %1699  ;;  %v1335_v9 = vsub.f32 1.0, %v1331_v44  ;;  %v1431_v27 = vmul.f32 %v1427_v26, %v1331_v44  ;;  %v1477_v50 = vmul.f32 0.6931472, %v1698_v48  ;;  %v1480_v39 = vsub.f32 %v1461_v37, %v1473_v6 }
 0x109   :  { %v1481_v22 = vsub.f32 %v1463_v23, %v1475_v45  ;;  %v1479_v58 = vmul.f32 0.6931472, %v1700_v3 }
 0x10a   :  { %v1447_v52 = vmul.f32 %v1443_v54, %v1335_v9  ;;  %v1482_v14 = vsub.f32 %v1465_v7, %v1477_v50  ;;  %v1488_v34 = vadd.f32 %v1484_v31, %v1480_v39 }
 0x10b   :  { %v1489_v55 = vadd.f32 %v1485_v33, %v1481_v22  ;;  %v1483_v46 = vsub.f32 %v1467_v51, %v1479_v58 }
 0x10c   :  { %v1451_v5 = vadd.f32 %v1447_v52, %v1431_v27  ;;  %v1490_v49 = vadd.f32 %v1486_v60, %v1482_v14  ;;  %v1591_v2 = vadd.f32 -1.0, %v1488_v34 }
 0x10d   :  { %v1592_v25 = vadd.f32 -1.0, %v1489_v55 }
 0x10e   :  { %v1455_v30 = vmul.f32 0.5, %v1451_v5  ;;  %v1593_v10 = vadd.f32 -1.0, %v1490_v49  ;;  %v1496_v17 = vadd.f32 1.0, %v1591_v2 }
 0x10f   :  { %v1497_v53 = vadd.f32 1.0, %v1592_v25 }
 0x110   :  { %v1487_v59 = vadd.f32 %v1455_v30, %v1415_v8  ;;  %v1498_v21 = vadd.f32 1.0, %v1593_v10  ;;  %1701 = vlog2.f32 %v1496_v17 }
 0x111   :  { %1703 = vlog2.f32 %v1497_v53 }
 0x112   :  { %v1491_v24 = vadd.f32 %v1487_v59, %v1483_v46  ;;  %1705 = vlog2.f32 %v1498_v21 }
 0x114   :  { %v1594_v28 = vadd.f32 -1.0, %v1491_v24 }
 0x116   :  { %v1499_v29 = vadd.f32 1.0, %v1594_v28 }
 0x118   :  { %1707 = vlog2.f32 %v1499_v29 }
 0x11d   :  { %v1702_v47 = vpop.eup %1701 }
 0x11e   :  { %v1704_v42 = vpop.eup %1703  ;;  %v1501_v40 = vmul.f32 0.6931472, %v1702_v47 }
 0x11f   :  { %v1706_v35 = vpop.eup %1705  ;;  %v1503_v57 = vmul.f32 0.6931472, %v1704_v42 }
 0x120   :  { %v1505_v0 = vmul.f32 0.6931472, %v1706_v35  ;;  %v1508_v12 = vadd.f32 1.0, %v1501_v40 }
 0x121   :  { %v1509_v4 = vadd.f32 1.0, %v1503_v57 }
 0x122   :  { %v1510_v43 = vadd.f32 1.0, %v1505_v0  ;;  %1709 = vrcp.f32 %v1508_v12 }
 0x123   :  { %1711 = vrcp.f32 %v1509_v4 }
 0x124   :  { %1713 = vrcp.f32 %v1510_v43 }
 0x125   :  { %v1708_v19 = vpop.eup %1707 }
 0x126   :  { %v1507_v1 = vmul.f32 0.6931472, %v1708_v19 }
 0x128   :  { %v1511_v36 = vadd.f32 1.0, %v1507_v1 }
 0x12a   :  { %1715 = vrcp.f32 %v1511_v36 }
 0x12f   :  { %v1710_v11 = vpop.eup %1709 }
 0x130   :  { %v1712_v16 = vpop.eup %1711  ;;  %v1520_v15 = vsub.f32 1.0, %v1710_v11 }
 0x131   :  { %v1714_v62 = vpop.eup %1713  ;;  %v1521_v41 = vsub.f32 1.0, %v1712_v16 }
 0x132   :  { %v1522_v38 = vsub.f32 1.0, %v1714_v62  ;;  %1524 = vst [vmem:[#allocation5] sm:$0xff] %v1520_v15 }
 0x133   :  { %1525 = vst [vmem:[#allocation5 + $0x8] sm:$0xff] %v1521_v41 }
 0x134   :  { %1526 = vst [vmem:[#allocation5 + $0x10] sm:$0xff] %v1522_v38 }
 0x137   :  { %v1716_v13 = vpop.eup %1715 }
 0x138   :  { %v1523_v32 = vsub.f32 1.0, %v1716_v13 }
 0x13a   :  { %1527 = vst [vmem:[#allocation5 + $0x18] sm:$0xff] %v1523_v32 }
 0x13b   :  { %1751 = shalt.err (!%p1748_p9)
}
 0x13c   :  { %1537 = dma.vmem_to_hbm [thread:$0]  %s1535_s13, 512, %s2824_s1, [#allocation4]  }
 0x13d   :  { %1762 = dma.done.wait [#allocation4], 512  }
 0x13e   :  { %1763 = vsyncadd [#allocation4], 4294966784 }
 0x13f   :  { %1541 = vsyncpa [#allocation3], 1 }
 0x140   :  { %1542 = vsyncpa [#allocation4], 1 }

</bundles_post_ra>
